<compile_context>
chip_gen: v7x
topology: tpu7x:2x2x1
jax: 0.10.0
libtpu: 0.0.40
codegen_flags: <defaults>
</compile_context>

<pallas_src>
import functools
import math

import jax
import jax.numpy as jnp
from jax import lax
from jax.experimental import pallas as pl
from jax.experimental.pallas import tpu as pltpu

# ---------------- config (small, consistent with the module) ----------------
B, S = 2, 8            # batch, sequence length
LATENT = 16            # latent_dim
HIDDEN = 32            # gpt2_config.hidden_size
NH = 4                 # num attention heads
HD = HIDDEN // NH      # head dim
NLAYERS = 2            # gpt2 blocks
NINNER = 4 * HIDDEN    # mlp inner dim
NPOS = 16              # max positions (wpe table)
LN_EPS = 1e-5
FREE_BIT = 0.5
NEG_INF = -1e9
SCALE = 1.0 / math.sqrt(HD)
GELU_C = math.sqrt(2.0 / math.pi)

N_KERNEL_INPUTS = 15


# ---------------- in-kernel helpers (pure value math) ----------------
def _ln(x):
    # gamma/beta are folded into the following matmul; only normalization remains.
    mean = jnp.mean(x, axis=-1, keepdims=True)
    var = jnp.mean(jnp.square(x - mean), axis=-1, keepdims=True)
    return (x - mean) * lax.rsqrt(var + LN_EPS)


def _gelu_new(x):
    # GPT-2 "gelu_new"
    return 0.5 * x * (1.0 + jnp.tanh(GELU_C * (x + 0.044715 * x * x * x)))


# ---------------- fused forward kernel ----------------
def _fused_forward_kernel(
    # inputs
    x_ref,             # [B*S, LATENT]   f32 flattened inputs_embeds
    mask_add_ref,      # [B, S, S]       f32 combined causal + key-padding additive mask
    mask_tok_ref,      # [B*S, 1]        f32 token validity (1/0) for the KL reduction
    emb_w_ref,         # [LATENT, HIDDEN]            bf16
    wpe_ref,           # [B*S, HIDDEN]               f32  (pre-tiled host-side)
    attn_w_ref,        # [NLAYERS, HIDDEN, 3H]       bf16 (ln1 gamma folded in)
    attn_b_ref,        # [NLAYERS, 1, 3H]            f32  (ln1 beta folded in)
    attn_proj_w_ref,   # [NLAYERS, HIDDEN, HIDDEN]   bf16
    attn_proj_b_ref,   # [NLAYERS, 1, HIDDEN]        f32
    fc_w_ref,          # [NLAYERS, HIDDEN, NINNER]   bf16 (ln2 gamma folded in)
    fc_b_ref,          # [NLAYERS, 1, NINNER]        f32  (ln2 beta folded in)
    mlp_proj_w_ref,    # [NLAYERS, NINNER, HIDDEN]   bf16
    mlp_proj_b_ref,    # [NLAYERS, 1, HIDDEN]        f32
    proj_w_ref,        # [HIDDEN, 2*LATENT]          bf16 (lnf gamma folded in)
    proj_b_ref,        # [1, 2*LATENT]               f32  (lnf beta fold; proj has no bias)
    # outputs
    stats_ref,         # [B*S, 2*LATENT] f32  = [mu | std] (split in wrapper)
    zkl_ref,           # (1, 1) SMEM
    zklr_ref,          # (1, 1) SMEM
):
    # --- latent embedding (no bias) + pre-tiled position embeddings ---
    # NOTE: GPT-2 dropout layers are identity in eval mode; omitted.
    x_bf = x_ref[...].astype(jnp.bfloat16)
    h = (jnp.dot(x_bf, emb_w_ref[...], preferred_element_type=jnp.float32)
         + wpe_ref[...])                                           # [B*S, HIDDEN]

    mask_add = mask_add_ref[...]                                   # [B, S, S], hoisted

    for l in range(NLAYERS):
        # ---------------- attention sub-block ----------------
        a_in = _ln(h).astype(jnp.bfloat16)                         # gamma/beta in attn_w/b
        qkv = (jnp.dot(a_in, attn_w_ref[l], preferred_element_type=jnp.float32)
               + attn_b_ref[l])                                    # [B*S, 3*HIDDEN]
        qkv3 = qkv.reshape(B, S, 3 * HIDDEN)                       # tile-aligned sublane split

        head_outs = []
        for hi in range(NH):
            c0 = hi * HD
            q = qkv3[:, :, c0:c0 + HD].astype(jnp.bfloat16)                          # [B,S,HD]
            k = qkv3[:, :, HIDDEN + c0:HIDDEN + c0 + HD].astype(jnp.bfloat16)        # [B,S,HD]
            v = qkv3[:, :, 2 * HIDDEN + c0:2 * HIDDEN + c0 + HD].astype(jnp.bfloat16)
            # batched over B; contracts last dims (no explicit K transpose needed)
            s = jnp.einsum("bqd,bkd->bqk", q, k,
                           preferred_element_type=jnp.float32) * SCALE               # [B,S,S]
            s = s + mask_add
            s = s - jnp.max(s, axis=-1, keepdims=True)
            p = jnp.exp(s)
            p = p / jnp.sum(p, axis=-1, keepdims=True)             # exact softmax
            head_outs.append(
                jnp.einsum("bqk,bkd->bqd", p.astype(jnp.bfloat16), v,
                           preferred_element_type=jnp.float32))    # [B,S,HD]

        att = jnp.concatenate(head_outs, axis=-1).reshape(B * S, HIDDEN)  # value, no scratch
        a_out = (jnp.dot(att.astype(jnp.bfloat16), attn_proj_w_ref[l],
                         preferred_element_type=jnp.float32)
                 + attn_proj_b_ref[l])
        h = h + a_out

        # ---------------- MLP sub-block ----------------
        m_in = _ln(h).astype(jnp.bfloat16)                         # gamma/beta in fc_w/b
        m_h = _gelu_new(jnp.dot(m_in, fc_w_ref[l],
                                preferred_element_type=jnp.float32) + fc_b_ref[l])
        m_out = (jnp.dot(m_h.astype(jnp.bfloat16), mlp_proj_w_ref[l],
                         preferred_element_type=jnp.float32) + mlp_proj_b_ref[l])
        h = h + m_out

    # --- tail: final LN -> proj (lnf folded) -> combined [mu | std] + free-bit KL ---
    hf = _ln(h).astype(jnp.bfloat16)
    stats = (jnp.dot(hf, proj_w_ref[...], preferred_element_type=jnp.float32)
             + proj_b_ref[...])                                    # [B*S, 2*LATENT]

    lane = lax.broadcasted_iota(jnp.int32, (B * S, 2 * LATENT), 1)
    is_lv = lane >= LATENT                                         # log_var lanes
    ex = jnp.exp(0.5 * stats)                                      # std on log_var lanes
    stats_ref[...] = jnp.where(is_lv, ex, stats)                   # [mu | std], one store

    # KL( N(mu, std) || N(0,1) ) per token = mean_latent 0.5*(mu^2 + var - lv - 1);
    # mu lanes contribute mu^2, log_var lanes contribute var - lv - 1 (var = std*std).
    term = jnp.where(is_lv, ex * ex - stats - 1.0, stats * stats)
    kl_tok = 0.5 * jnp.sum(term, axis=-1, keepdims=True) * (1.0 / LATENT)  # [B*S, 1]
    mask_tok = mask_tok_ref[...]
    kl_tok = jnp.where(mask_tok > 0.5, kl_tok, 0.0)                # masked_fill
    attn_sum = jnp.sum(mask_tok)    # matches torch: inf/nan if mask is all-zero
    zkl_ref[0, 0] = jnp.sum(jnp.where(kl_tok > FREE_BIT, kl_tok, 0.0)) / attn_sum
    zklr_ref[0, 0] = jnp.sum(kl_tok) / attn_sum


def _run_fused(kp, x_flat, mask_add, mask_tok):
    return pl.pallas_call(
        _fused_forward_kernel,
        out_shape=(
            jax.ShapeDtypeStruct((B * S, 2 * LATENT), jnp.float32),  # [mu | std]
            jax.ShapeDtypeStruct((1, 1), jnp.float32),               # zkl
            jax.ShapeDtypeStruct((1, 1), jnp.float32),               # zkl_real
        ),
        in_specs=[pl.BlockSpec(memory_space=pltpu.MemorySpace.VMEM)] * N_KERNEL_INPUTS,
        out_specs=(
            pl.BlockSpec(memory_space=pltpu.MemorySpace.VMEM),
            pl.BlockSpec(memory_space=pltpu.MemorySpace.SMEM),
            pl.BlockSpec(memory_space=pltpu.MemorySpace.SMEM),
        ),
    )(
        x_flat, mask_add, mask_tok,
        kp["emb_w"], kp["wpe_tiled"],
        kp["attn_w"], kp["attn_b"], kp["attn_proj_w"], kp["attn_proj_b"],
        kp["fc_w"], kp["fc_b"], kp["mlp_proj_w"], kp["mlp_proj_b"],
        kp["proj_w"], kp["proj_b"],
    )


# ---------------- parameters (module-faithful f32 init) ----------------
def init_params(key):
    keys = jax.random.split(key, 8)
    kit = iter(keys)

    def nrm(shape, scale=0.02):
        return (scale * jax.random.normal(next(kit), shape)).astype(jnp.float32)

    return {
        "emb_w": nrm((LATENT, HIDDEN)),            # nn.Linear(latent, hidden, bias=False)
        "wpe": nrm((NPOS, HIDDEN)),                # GPT-2 position embeddings
        "proj_w": nrm((HIDDEN, 2 * LATENT)),       # nn.Linear(hidden, 2*latent, bias=False)
        "ln_f_g": jnp.ones((1, HIDDEN), jnp.float32),
        "ln_f_b": jnp.zeros((1, HIDDEN), jnp.float32),
        "blocks": {
            "ln1_g": jnp.ones((NLAYERS, 1, HIDDEN), jnp.float32),
            "ln1_b": jnp.zeros((NLAYERS, 1, HIDDEN), jnp.float32),
            "ln2_g": jnp.ones((NLAYERS, 1, HIDDEN), jnp.float32),
            "ln2_b": jnp.zeros((NLAYERS, 1, HIDDEN), jnp.float32),
            "attn_w": nrm((NLAYERS, HIDDEN, 3 * HIDDEN)),
            "attn_b": jnp.zeros((NLAYERS, 1, 3 * HIDDEN), jnp.float32),
            "attn_proj_w": nrm((NLAYERS, HIDDEN, HIDDEN)),
            "attn_proj_b": jnp.zeros((NLAYERS, 1, HIDDEN), jnp.float32),
            "fc_w": nrm((NLAYERS, HIDDEN, NINNER)),
            "fc_b": jnp.zeros((NLAYERS, 1, NINNER), jnp.float32),
            "mlp_proj_w": nrm((NLAYERS, NINNER, HIDDEN)),
            "mlp_proj_b": jnp.zeros((NLAYERS, 1, HIDDEN), jnp.float32),
        },
    }


def fold_params(params):
    """One-time host-side fold: LN gamma/beta into following matmuls, wpe pre-tiled,
    all matmul weights cast to bf16 (f32 accumulation stays in-kernel)."""
    blk = params["blocks"]
    # (x_norm*g + b) @ W + c  ==  x_norm @ (g[:,None]*W)  +  (b @ W + c)
    attn_b_f = jnp.einsum("loh,lhk->lok", blk["ln1_b"], blk["attn_w"]) + blk["attn_b"]
    attn_w_f = jnp.swapaxes(blk["ln1_g"], 1, 2) * blk["attn_w"]
    fc_b_f = jnp.einsum("loh,lhn->lon", blk["ln2_b"], blk["fc_w"]) + blk["fc_b"]
    fc_w_f = jnp.swapaxes(blk["ln2_g"], 1, 2) * blk["fc_w"]
    proj_b_f = params["ln_f_b"] @ params["proj_w"]                 # proj has no own bias
    proj_w_f = params["ln_f_g"].T * params["proj_w"]
    return {
        "emb_w": params["emb_w"].astype(jnp.bfloat16),
        "wpe_tiled": jnp.tile(params["wpe"][:S], (B, 1)).astype(jnp.float32),
        "attn_w": attn_w_f.astype(jnp.bfloat16),
        "attn_b": attn_b_f.astype(jnp.float32),
        "attn_proj_w": blk["attn_proj_w"].astype(jnp.bfloat16),
        "attn_proj_b": blk["attn_proj_b"].astype(jnp.float32),
        "fc_w": fc_w_f.astype(jnp.bfloat16),
        "fc_b": fc_b_f.astype(jnp.float32),
        "mlp_proj_w": blk["mlp_proj_w"].astype(jnp.bfloat16),
        "mlp_proj_b": blk["mlp_proj_b"].astype(jnp.float32),
        "proj_w": proj_w_f.astype(jnp.bfloat16),
        "proj_b": proj_b_f.astype(jnp.float32),
    }


# ---------------- forward pass (matches SentenceGPT.forward semantics) ------
@functools.partial(jax.jit, static_argnames=("compute_kldiv_loss",))
def sentence_gpt_forward(kparams, inputs_embeds, attention_mask,
                         compute_kldiv_loss=True):
    x_flat = inputs_embeds.reshape(B * S, LATENT).astype(jnp.float32)
    attn_f = attention_mask.astype(jnp.float32)                     # [B, S]

    # combined causal + key-padding additive mask (single NEG_INF per masked slot)
    causal = jnp.tril(jnp.ones((S, S), dtype=bool))
    key_ok = attn_f[:, None, :] > 0.5                                # [B, 1, S]
    mask_add = jnp.where(causal[None, :, :] & key_ok, 0.0, NEG_INF).astype(jnp.float32)
    mask_tok = attn_f.reshape(B * S, 1)

    stats, zkl, zkl_real = _run_fused(kparams, x_flat, mask_add, mask_tok)
    mu = stats[:, :LATENT].reshape(B, S, LATENT)
    std = stats[:, LATENT:].reshape(B, S, LATENT)

    # SentenceGPTOutput(latent=Normal(mu, std), zkl, zkl_real)
    # TODO(synk): torch.distributions.Normal has no Pallas/JAX-array equivalent;
    #             the latent distribution is returned as its (mu, std) parameters.
    if compute_kldiv_loss:
        return (mu, std), zkl[0, 0], zkl_real[0, 0]
    return (mu, std), None, None


# ---------------- driver ----------------
if __name__ == "__main__":
    key = jax.random.PRNGKey(0)
    k_param, k_inp = jax.random.split(key)

    params = init_params(k_param)
    kparams = fold_params(params)

    inputs_embeds = jax.random.normal(k_inp, (B, S, LATENT), dtype=jnp.float32)
    attention_mask = jnp.array(
        [[1, 1, 1, 1, 1, 1, 1, 1],
         [1, 1, 1, 1, 1, 0, 0, 0]], dtype=jnp.int32)

    (mu, std), zkl, zkl_real = sentence_gpt_forward(
        kparams, inputs_embeds, attention_mask, compute_kldiv_loss=True)

    jax.block_until_ready((mu, std, zkl, zkl_real))
    assert mu.shape == (B, S, LATENT) and std.shape == (B, S, LATENT)
    assert zkl.shape == () and zkl_real.shape == ()
    assert bool(jnp.isfinite(mu).all()) and bool(jnp.isfinite(std).all())
    assert bool(jnp.isfinite(zkl)) and bool(jnp.isfinite(zkl_real))
    print("KERNEL_OK")
</pallas_src>

<mosaic_0001>
module attributes {stable_mosaic.version = 11 : i64} {
  func.func @_fused_forward_kernel(%arg0: memref<16x16xf32, #tpu.memory_space<vmem>>, %arg1: memref<2x8x8xf32, #tpu.memory_space<vmem>>, %arg2: memref<16x1xf32, #tpu.memory_space<vmem>>, %arg3: memref<16x32xbf16, #tpu.memory_space<vmem>>, %arg4: memref<16x32xf32, #tpu.memory_space<vmem>>, %arg5: memref<2x32x96xbf16, #tpu.memory_space<vmem>>, %arg6: memref<2x1x96xf32, #tpu.memory_space<vmem>>, %arg7: memref<2x32x32xbf16, #tpu.memory_space<vmem>>, %arg8: memref<2x1x32xf32, #tpu.memory_space<vmem>>, %arg9: memref<2x32x128xbf16, #tpu.memory_space<vmem>>, %arg10: memref<2x1x128xf32, #tpu.memory_space<vmem>>, %arg11: memref<2x128x32xbf16, #tpu.memory_space<vmem>>, %arg12: memref<2x1x32xf32, #tpu.memory_space<vmem>>, %arg13: memref<32x32xbf16, #tpu.memory_space<vmem>>, %arg14: memref<1x32xf32, #tpu.memory_space<vmem>>, %arg15: memref<16x32xf32, #tpu.memory_space<vmem>>, %arg16: memref<1x1xf32, #tpu.memory_space<smem>>, %arg17: memref<1x1xf32, #tpu.memory_space<smem>>) attributes {dimension_semantics = [], scalar_prefetch = 0 : i64, scratch_operands = 0 : i64, tpu.core_type = #tpu.core_type<tc>} {
    %c0 = arith.constant 0 : index
    %c0_0 = arith.constant 0 : index
    %0 = vector.load %arg0[%c0, %c0_0] : memref<16x16xf32, #tpu.memory_space<vmem>>, vector<16x16xf32>
    %1 = arith.truncf %0 : vector<16x16xf32> to vector<16x16xbf16>
    %c0_1 = arith.constant 0 : index
    %c0_2 = arith.constant 0 : index
    %2 = vector.load %arg3[%c0_1, %c0_2] : memref<16x32xbf16, #tpu.memory_space<vmem>>, vector<16x32xbf16>
    %cst = arith.constant dense<0.000000e+00> : vector<16x32xf32>
    %3 = tpu.matmul %1, %2, %cst {dimension_numbers = #tpu.dot_dimension_numbers<[1], [0], [0], [1], [0, 0, 1, 1], [], []>} : vector<16x16xbf16>, vector<16x32xbf16>, vector<16x32xf32> -> vector<16x32xf32>
    %c0_3 = arith.constant 0 : index
    %c0_4 = arith.constant 0 : index
    %4 = vector.load %arg4[%c0_3, %c0_4] : memref<16x32xf32, #tpu.memory_space<vmem>>, vector<16x32xf32>
    %5 = arith.addf %3, %4 : vector<16x32xf32>
    %c0_5 = arith.constant 0 : index
    %c0_6 = arith.constant 0 : index
    %c0_7 = arith.constant 0 : index
    %6 = vector.load %arg1[%c0_5, %c0_6, %c0_7] : memref<2x8x8xf32, #tpu.memory_space<vmem>>, vector<2x8x8xf32>
    %cst_8 = arith.constant dense<0.000000e+00> : vector<16xf32>
    %7 = vector.multi_reduction <add>, %5, %cst_8 [1] : vector<16x32xf32> to vector<16xf32>
    %8 = vector.shape_cast %7 : vector<16xf32> to vector<16x1xf32>
    %cst_9 = arith.constant 3.200000e+01 : f32
    %9 = vector.broadcast %cst_9 : f32 to vector<16x1xf32>
    %10 = arith.divf %8, %9 : vector<16x1xf32>
    %11 = vector.broadcast %10 : vector<16x1xf32> to vector<16x32xf32>
    %12 = arith.subf %5, %11 : vector<16x32xf32>
    %13 = arith.mulf %12, %12 : vector<16x32xf32>
    %cst_10 = arith.constant dense<0.000000e+00> : vector<16xf32>
    %14 = vector.multi_reduction <add>, %13, %cst_10 [1] : vector<16x32xf32> to vector<16xf32>
    %15 = vector.shape_cast %14 : vector<16xf32> to vector<16x1xf32>
    %cst_11 = arith.constant 3.200000e+01 : f32
    %16 = vector.broadcast %cst_11 : f32 to vector<16x1xf32>
    %17 = arith.divf %15, %16 : vector<16x1xf32>
    %18 = vector.broadcast %10 : vector<16x1xf32> to vector<16x32xf32>
    %19 = arith.subf %5, %18 : vector<16x32xf32>
    %cst_12 = arith.constant 9.99999974E-6 : f32
    %20 = vector.broadcast %cst_12 : f32 to vector<16x1xf32>
    %21 = arith.addf %17, %20 : vector<16x1xf32>
    %22 = math.rsqrt %21 : vector<16x1xf32>
    %23 = vector.broadcast %22 : vector<16x1xf32> to vector<16x32xf32>
    %24 = arith.mulf %19, %23 : vector<16x32xf32>
    %25 = arith.truncf %24 : vector<16x32xf32> to vector<16x32xbf16>
    %c0_13 = arith.constant 0 : index
    %c0_14 = arith.constant 0 : index
    %c0_15 = arith.constant 0 : index
    %26 = vector.load %arg5[%c0_13, %c0_14, %c0_15] : memref<2x32x96xbf16, #tpu.memory_space<vmem>>, vector<1x32x96xbf16>
    %27 = vector.shape_cast %26 : vector<1x32x96xbf16> to vector<32x96xbf16>
    %cst_16 = arith.constant dense<0.000000e+00> : vector<16x96xf32>
    %28 = tpu.matmul %25, %27, %cst_16 {dimension_numbers = #tpu.dot_dimension_numbers<[1], [0], [0], [1], [0, 0, 1, 1], [], []>} : vector<16x32xbf16>, vector<32x96xbf16>, vector<16x96xf32> -> vector<16x96xf32>
    %c0_17 = arith.constant 0 : index
    %c0_18 = arith.constant 0 : index
    %c0_19 = arith.constant 0 : index
    %29 = vector.load %arg6[%c0_17, %c0_18, %c0_19] : memref<2x1x96xf32, #tpu.memory_space<vmem>>, vector<1x1x96xf32>
    %30 = vector.shape_cast %29 : vector<1x1x96xf32> to vector<1x96xf32>
    %31 = vector.broadcast %30 : vector<1x96xf32> to vector<16x96xf32>
    %32 = arith.addf %28, %31 : vector<16x96xf32>
    %33 = vector.shape_cast %32 : vector<16x96xf32> to vector<2x8x96xf32>
    %34 = vector.extract_strided_slice %33 {offsets = [0, 0, 0], sizes = [2, 8, 8], strides = [1, 1, 1]} : vector<2x8x96xf32> to vector<2x8x8xf32>
    %35 = arith.truncf %34 : vector<2x8x8xf32> to vector<2x8x8xbf16>
    %36 = vector.extract_strided_slice %33 {offsets = [0, 0, 32], sizes = [2, 8, 8], strides = [1, 1, 1]} : vector<2x8x96xf32> to vector<2x8x8xf32>
    %37 = arith.truncf %36 : vector<2x8x8xf32> to vector<2x8x8xbf16>
    %38 = vector.extract_strided_slice %33 {offsets = [0, 0, 64], sizes = [2, 8, 8], strides = [1, 1, 1]} : vector<2x8x96xf32> to vector<2x8x8xf32>
    %39 = arith.truncf %38 : vector<2x8x8xf32> to vector<2x8x8xbf16>
    "tpu.trace_start"() <{level = 10 : i32, message = "bqd,bkd->bqk"}> : () -> ()
    %cst_20 = arith.constant dense<0.000000e+00> : vector<2x8x8xf32>
    %40 = tpu.matmul %35, %37, %cst_20 {dimension_numbers = #tpu.dot_dimension_numbers<[2], [2], [1], [1], [0, 0, 0, 1, 1, 1], [0], [0]>} : vector<2x8x8xbf16>, vector<2x8x8xbf16>, vector<2x8x8xf32> -> vector<2x8x8xf32>
    "tpu.trace_stop"() : () -> ()
    %cst_21 = arith.constant 0.353553385 : f32
    %41 = vector.broadcast %cst_21 : f32 to vector<2x8x8xf32>
    %42 = arith.mulf %40, %41 : vector<2x8x8xf32>
    %43 = arith.addf %42, %6 : vector<2x8x8xf32>
    %cst_22 = arith.constant dense<0xFF800000> : vector<2x8xf32>
    %44 = vector.multi_reduction <maximumf>, %43, %cst_22 [2] : vector<2x8x8xf32> to vector<2x8xf32>
    %45 = vector.shape_cast %44 : vector<2x8xf32> to vector<2x8x1xf32>
    %46 = vector.broadcast %45 : vector<2x8x1xf32> to vector<2x8x8xf32>
    %47 = arith.subf %43, %46 : vector<2x8x8xf32>
    %48 = math.exp %47 : vector<2x8x8xf32>
    %cst_23 = arith.constant dense<0.000000e+00> : vector<2x8xf32>
    %49 = vector.multi_reduction <add>, %48, %cst_23 [2] : vector<2x8x8xf32> to vector<2x8xf32>
    %50 = vector.shape_cast %49 : vector<2x8xf32> to vector<2x8x1xf32>
    %51 = vector.broadcast %50 : vector<2x8x1xf32> to vector<2x8x8xf32>
    %52 = arith.divf %48, %51 : vector<2x8x8xf32>
    %53 = arith.truncf %52 : vector<2x8x8xf32> to vector<2x8x8xbf16>
    "tpu.trace_start"() <{level = 10 : i32, message = "bqk,bkd->bqd"}> : () -> ()
    %cst_24 = arith.constant dense<0.000000e+00> : vector<2x8x8xf32>
    %54 = tpu.matmul %53, %39, %cst_24 {dimension_numbers = #tpu.dot_dimension_numbers<[2], [1], [1], [2], [0, 0, 0, 1, 1, 2], [0], [0]>} : vector<2x8x8xbf16>, vector<2x8x8xbf16>, vector<2x8x8xf32> -> vector<2x8x8xf32>
    "tpu.trace_stop"() : () -> ()
    %55 = vector.extract_strided_slice %33 {offsets = [0, 0, 8], sizes = [2, 8, 8], strides = [1, 1, 1]} : vector<2x8x96xf32> to vector<2x8x8xf32>
    %56 = arith.truncf %55 : vector<2x8x8xf32> to vector<2x8x8xbf16>
    %57 = vector.extract_strided_slice %33 {offsets = [0, 0, 40], sizes = [2, 8, 8], strides = [1, 1, 1]} : vector<2x8x96xf32> to vector<2x8x8xf32>
    %58 = arith.truncf %57 : vector<2x8x8xf32> to vector<2x8x8xbf16>
    %59 = vector.extract_strided_slice %33 {offsets = [0, 0, 72], sizes = [2, 8, 8], strides = [1, 1, 1]} : vector<2x8x96xf32> to vector<2x8x8xf32>
    %60 = arith.truncf %59 : vector<2x8x8xf32> to vector<2x8x8xbf16>
    "tpu.trace_start"() <{level = 10 : i32, message = "bqd,bkd->bqk"}> : () -> ()
    %cst_25 = arith.constant dense<0.000000e+00> : vector<2x8x8xf32>
    %61 = tpu.matmul %56, %58, %cst_25 {dimension_numbers = #tpu.dot_dimension_numbers<[2], [2], [1], [1], [0, 0, 0, 1, 1, 1], [0], [0]>} : vector<2x8x8xbf16>, vector<2x8x8xbf16>, vector<2x8x8xf32> -> vector<2x8x8xf32>
    "tpu.trace_stop"() : () -> ()
    %cst_26 = arith.constant 0.353553385 : f32
    %62 = vector.broadcast %cst_26 : f32 to vector<2x8x8xf32>
    %63 = arith.mulf %61, %62 : vector<2x8x8xf32>
    %64 = arith.addf %63, %6 : vector<2x8x8xf32>
    %cst_27 = arith.constant dense<0xFF800000> : vector<2x8xf32>
    %65 = vector.multi_reduction <maximumf>, %64, %cst_27 [2] : vector<2x8x8xf32> to vector<2x8xf32>
    %66 = vector.shape_cast %65 : vector<2x8xf32> to vector<2x8x1xf32>
    %67 = vector.broadcast %66 : vector<2x8x1xf32> to vector<2x8x8xf32>
    %68 = arith.subf %64, %67 : vector<2x8x8xf32>
    %69 = math.exp %68 : vector<2x8x8xf32>
    %cst_28 = arith.constant dense<0.000000e+00> : vector<2x8xf32>
    %70 = vector.multi_reduction <add>, %69, %cst_28 [2] : vector<2x8x8xf32> to vector<2x8xf32>
    %71 = vector.shape_cast %70 : vector<2x8xf32> to vector<2x8x1xf32>
    %72 = vector.broadcast %71 : vector<2x8x1xf32> to vector<2x8x8xf32>
    %73 = arith.divf %69, %72 : vector<2x8x8xf32>
    %74 = arith.truncf %73 : vector<2x8x8xf32> to vector<2x8x8xbf16>
    "tpu.trace_start"() <{level = 10 : i32, message = "bqk,bkd->bqd"}> : () -> ()
    %cst_29 = arith.constant dense<0.000000e+00> : vector<2x8x8xf32>
    %75 = tpu.matmul %74, %60, %cst_29 {dimension_numbers = #tpu.dot_dimension_numbers<[2], [1], [1], [2], [0, 0, 0, 1, 1, 2], [0], [0]>} : vector<2x8x8xbf16>, vector<2x8x8xbf16>, vector<2x8x8xf32> -> vector<2x8x8xf32>
    "tpu.trace_stop"() : () -> ()
    %76 = vector.extract_strided_slice %33 {offsets = [0, 0, 16], sizes = [2, 8, 8], strides = [1, 1, 1]} : vector<2x8x96xf32> to vector<2x8x8xf32>
    %77 = arith.truncf %76 : vector<2x8x8xf32> to vector<2x8x8xbf16>
    %78 = vector.extract_strided_slice %33 {offsets = [0, 0, 48], sizes = [2, 8, 8], strides = [1, 1, 1]} : vector<2x8x96xf32> to vector<2x8x8xf32>
    %79 = arith.truncf %78 : vector<2x8x8xf32> to vector<2x8x8xbf16>
    %80 = vector.extract_strided_slice %33 {offsets = [0, 0, 80], sizes = [2, 8, 8], strides = [1, 1, 1]} : vector<2x8x96xf32> to vector<2x8x8xf32>
    %81 = arith.truncf %80 : vector<2x8x8xf32> to vector<2x8x8xbf16>
    "tpu.trace_start"() <{level = 10 : i32, message = "bqd,bkd->bqk"}> : () -> ()
    %cst_30 = arith.constant dense<0.000000e+00> : vector<2x8x8xf32>
    %82 = tpu.matmul %77, %79, %cst_30 {dimension_numbers = #tpu.dot_dimension_numbers<[2], [2], [1], [1], [0, 0, 0, 1, 1, 1], [0], [0]>} : vector<2x8x8xbf16>, vector<2x8x8xbf16>, vector<2x8x8xf32> -> vector<2x8x8xf32>
    "tpu.trace_stop"() : () -> ()
    %cst_31 = arith.constant 0.353553385 : f32
    %83 = vector.broadcast %cst_31 : f32 to vector<2x8x8xf32>
    %84 = arith.mulf %82, %83 : vector<2x8x8xf32>
    %85 = arith.addf %84, %6 : vector<2x8x8xf32>
    %cst_32 = arith.constant dense<0xFF800000> : vector<2x8xf32>
    %86 = vector.multi_reduction <maximumf>, %85, %cst_32 [2] : vector<2x8x8xf32> to vector<2x8xf32>
    %87 = vector.shape_cast %86 : vector<2x8xf32> to vector<2x8x1xf32>
    %88 = vector.broadcast %87 : vector<2x8x1xf32> to vector<2x8x8xf32>
    %89 = arith.subf %85, %88 : vector<2x8x8xf32>
    %90 = math.exp %89 : vector<2x8x8xf32>
    %cst_33 = arith.constant dense<0.000000e+00> : vector<2x8xf32>
    %91 = vector.multi_reduction <add>, %90, %cst_33 [2] : vector<2x8x8xf32> to vector<2x8xf32>
    %92 = vector.shape_cast %91 : vector<2x8xf32> to vector<2x8x1xf32>
    %93 = vector.broadcast %92 : vector<2x8x1xf32> to vector<2x8x8xf32>
    %94 = arith.divf %90, %93 : vector<2x8x8xf32>
    %95 = arith.truncf %94 : vector<2x8x8xf32> to vector<2x8x8xbf16>
    "tpu.trace_start"() <{level = 10 : i32, message = "bqk,bkd->bqd"}> : () -> ()
    %cst_34 = arith.constant dense<0.000000e+00> : vector<2x8x8xf32>
    %96 = tpu.matmul %95, %81, %cst_34 {dimension_numbers = #tpu.dot_dimension_numbers<[2], [1], [1], [2], [0, 0, 0, 1, 1, 2], [0], [0]>} : vector<2x8x8xbf16>, vector<2x8x8xbf16>, vector<2x8x8xf32> -> vector<2x8x8xf32>
    "tpu.trace_stop"() : () -> ()
    %97 = vector.extract_strided_slice %33 {offsets = [0, 0, 24], sizes = [2, 8, 8], strides = [1, 1, 1]} : vector<2x8x96xf32> to vector<2x8x8xf32>
    %98 = arith.truncf %97 : vector<2x8x8xf32> to vector<2x8x8xbf16>
    %99 = vector.extract_strided_slice %33 {offsets = [0, 0, 56], sizes = [2, 8, 8], strides = [1, 1, 1]} : vector<2x8x96xf32> to vector<2x8x8xf32>
    %100 = arith.truncf %99 : vector<2x8x8xf32> to vector<2x8x8xbf16>
    %101 = vector.extract_strided_slice %33 {offsets = [0, 0, 88], sizes = [2, 8, 8], strides = [1, 1, 1]} : vector<2x8x96xf32> to vector<2x8x8xf32>
    %102 = arith.truncf %101 : vector<2x8x8xf32> to vector<2x8x8xbf16>
    "tpu.trace_start"() <{level = 10 : i32, message = "bqd,bkd->bqk"}> : () -> ()
    %cst_35 = arith.constant dense<0.000000e+00> : vector<2x8x8xf32>
    %103 = tpu.matmul %98, %100, %cst_35 {dimension_numbers = #tpu.dot_dimension_numbers<[2], [2], [1], [1], [0, 0, 0, 1, 1, 1], [0], [0]>} : vector<2x8x8xbf16>, vector<2x8x8xbf16>, vector<2x8x8xf32> -> vector<2x8x8xf32>
    "tpu.trace_stop"() : () -> ()
    %cst_36 = arith.constant 0.353553385 : f32
    %104 = vector.broadcast %cst_36 : f32 to vector<2x8x8xf32>
    %105 = arith.mulf %103, %104 : vector<2x8x8xf32>
    %106 = arith.addf %105, %6 : vector<2x8x8xf32>
    %cst_37 = arith.constant dense<0xFF800000> : vector<2x8xf32>
    %107 = vector.multi_reduction <maximumf>, %106, %cst_37 [2] : vector<2x8x8xf32> to vector<2x8xf32>
    %108 = vector.shape_cast %107 : vector<2x8xf32> to vector<2x8x1xf32>
    %109 = vector.broadcast %108 : vector<2x8x1xf32> to vector<2x8x8xf32>
    %110 = arith.subf %106, %109 : vector<2x8x8xf32>
    %111 = math.exp %110 : vector<2x8x8xf32>
    %cst_38 = arith.constant dense<0.000000e+00> : vector<2x8xf32>
    %112 = vector.multi_reduction <add>, %111, %cst_38 [2] : vector<2x8x8xf32> to vector<2x8xf32>
    %113 = vector.shape_cast %112 : vector<2x8xf32> to vector<2x8x1xf32>
    %114 = vector.broadcast %113 : vector<2x8x1xf32> to vector<2x8x8xf32>
    %115 = arith.divf %111, %114 : vector<2x8x8xf32>
    %116 = arith.truncf %115 : vector<2x8x8xf32> to vector<2x8x8xbf16>
    "tpu.trace_start"() <{level = 10 : i32, message = "bqk,bkd->bqd"}> : () -> ()
    %cst_39 = arith.constant dense<0.000000e+00> : vector<2x8x8xf32>
    %117 = tpu.matmul %116, %102, %cst_39 {dimension_numbers = #tpu.dot_dimension_numbers<[2], [1], [1], [2], [0, 0, 0, 1, 1, 2], [0], [0]>} : vector<2x8x8xbf16>, vector<2x8x8xbf16>, vector<2x8x8xf32> -> vector<2x8x8xf32>
    "tpu.trace_stop"() : () -> ()
    %118 = tpu.concatenate %54, %75, %96, %117 in 2 : vector<2x8x8xf32>, vector<2x8x8xf32>, vector<2x8x8xf32>, vector<2x8x8xf32> -> vector<2x8x32xf32>
    %119 = vector.shape_cast %118 : vector<2x8x32xf32> to vector<16x32xf32>
    %120 = arith.truncf %119 : vector<16x32xf32> to vector<16x32xbf16>
    %c0_40 = arith.constant 0 : index
    %c0_41 = arith.constant 0 : index
    %c0_42 = arith.constant 0 : index
    %121 = vector.load %arg7[%c0_40, %c0_41, %c0_42] : memref<2x32x32xbf16, #tpu.memory_space<vmem>>, vector<1x32x32xbf16>
    %122 = vector.shape_cast %121 : vector<1x32x32xbf16> to vector<32x32xbf16>
    %cst_43 = arith.constant dense<0.000000e+00> : vector<16x32xf32>
    %123 = tpu.matmul %120, %122, %cst_43 {dimension_numbers = #tpu.dot_dimension_numbers<[1], [0], [0], [1], [0, 0, 1, 1], [], []>} : vector<16x32xbf16>, vector<32x32xbf16>, vector<16x32xf32> -> vector<16x32xf32>
    %c0_44 = arith.constant 0 : index
    %c0_45 = arith.constant 0 : index
    %c0_46 = arith.constant 0 : index
    %124 = vector.load %arg8[%c0_44, %c0_45, %c0_46] : memref<2x1x32xf32, #tpu.memory_space<vmem>>, vector<1x1x32xf32>
    %125 = vector.shape_cast %124 : vector<1x1x32xf32> to vector<1x32xf32>
    %126 = vector.broadcast %125 : vector<1x32xf32> to vector<16x32xf32>
    %127 = arith.addf %123, %126 : vector<16x32xf32>
    %128 = arith.addf %5, %127 : vector<16x32xf32>
    %cst_47 = arith.constant dense<0.000000e+00> : vector<16xf32>
    %129 = vector.multi_reduction <add>, %128, %cst_47 [1] : vector<16x32xf32> to vector<16xf32>
    %130 = vector.shape_cast %129 : vector<16xf32> to vector<16x1xf32>
    %cst_48 = arith.constant 3.200000e+01 : f32
    %131 = vector.broadcast %cst_48 : f32 to vector<16x1xf32>
    %132 = arith.divf %130, %131 : vector<16x1xf32>
    %133 = vector.broadcast %132 : vector<16x1xf32> to vector<16x32xf32>
    %134 = arith.subf %128, %133 : vector<16x32xf32>
    %135 = arith.mulf %134, %134 : vector<16x32xf32>
    %cst_49 = arith.constant dense<0.000000e+00> : vector<16xf32>
    %136 = vector.multi_reduction <add>, %135, %cst_49 [1] : vector<16x32xf32> to vector<16xf32>
    %137 = vector.shape_cast %136 : vector<16xf32> to vector<16x1xf32>
    %cst_50 = arith.constant 3.200000e+01 : f32
    %138 = vector.broadcast %cst_50 : f32 to vector<16x1xf32>
    %139 = arith.divf %137, %138 : vector<16x1xf32>
    %140 = vector.broadcast %132 : vector<16x1xf32> to vector<16x32xf32>
    %141 = arith.subf %128, %140 : vector<16x32xf32>
    %cst_51 = arith.constant 9.99999974E-6 : f32
    %142 = vector.broadcast %cst_51 : f32 to vector<16x1xf32>
    %143 = arith.addf %139, %142 : vector<16x1xf32>
    %144 = math.rsqrt %143 : vector<16x1xf32>
    %145 = vector.broadcast %144 : vector<16x1xf32> to vector<16x32xf32>
    %146 = arith.mulf %141, %145 : vector<16x32xf32>
    %147 = arith.truncf %146 : vector<16x32xf32> to vector<16x32xbf16>
    %c0_52 = arith.constant 0 : index
    %c0_53 = arith.constant 0 : index
    %c0_54 = arith.constant 0 : index
    %148 = vector.load %arg9[%c0_52, %c0_53, %c0_54] : memref<2x32x128xbf16, #tpu.memory_space<vmem>>, vector<1x32x128xbf16>
    %149 = vector.shape_cast %148 : vector<1x32x128xbf16> to vector<32x128xbf16>
    %cst_55 = arith.constant dense<0.000000e+00> : vector<16x128xf32>
    %150 = tpu.matmul %147, %149, %cst_55 {dimension_numbers = #tpu.dot_dimension_numbers<[1], [0], [0], [1], [0, 0, 1, 1], [], []>} : vector<16x32xbf16>, vector<32x128xbf16>, vector<16x128xf32> -> vector<16x128xf32>
    %c0_56 = arith.constant 0 : index
    %c0_57 = arith.constant 0 : index
    %c0_58 = arith.constant 0 : index
    %151 = vector.load %arg10[%c0_56, %c0_57, %c0_58] : memref<2x1x128xf32, #tpu.memory_space<vmem>>, vector<1x1x128xf32>
    %152 = vector.shape_cast %151 : vector<1x1x128xf32> to vector<1x128xf32>
    %153 = vector.broadcast %152 : vector<1x128xf32> to vector<16x128xf32>
    %154 = arith.addf %150, %153 : vector<16x128xf32>
    %cst_59 = arith.constant 5.000000e-01 : f32
    %155 = vector.broadcast %cst_59 : f32 to vector<16x128xf32>
    %156 = arith.mulf %155, %154 : vector<16x128xf32>
    %cst_60 = arith.constant 4.471500e-02 : f32
    %157 = vector.broadcast %cst_60 : f32 to vector<16x128xf32>
    %158 = arith.mulf %157, %154 : vector<16x128xf32>
    %159 = arith.mulf %158, %154 : vector<16x128xf32>
    %160 = arith.mulf %159, %154 : vector<16x128xf32>
    %161 = arith.addf %154, %160 : vector<16x128xf32>
    %cst_61 = arith.constant 0.797884583 : f32
    %162 = vector.broadcast %cst_61 : f32 to vector<16x128xf32>
    %163 = arith.mulf %162, %161 : vector<16x128xf32>
    %164 = math.tanh %163 : vector<16x128xf32>
    %cst_62 = arith.constant 1.000000e+00 : f32
    %165 = vector.broadcast %cst_62 : f32 to vector<16x128xf32>
    %166 = arith.addf %165, %164 : vector<16x128xf32>
    %167 = arith.mulf %156, %166 : vector<16x128xf32>
    %168 = arith.truncf %167 : vector<16x128xf32> to vector<16x128xbf16>
    %c0_63 = arith.constant 0 : index
    %c0_64 = arith.constant 0 : index
    %c0_65 = arith.constant 0 : index
    %169 = vector.load %arg11[%c0_63, %c0_64, %c0_65] : memref<2x128x32xbf16, #tpu.memory_space<vmem>>, vector<1x128x32xbf16>
    %170 = vector.shape_cast %169 : vector<1x128x32xbf16> to vector<128x32xbf16>
    %cst_66 = arith.constant dense<0.000000e+00> : vector<16x32xf32>
    %171 = tpu.matmul %168, %170, %cst_66 {dimension_numbers = #tpu.dot_dimension_numbers<[1], [0], [0], [1], [0, 0, 1, 1], [], []>} : vector<16x128xbf16>, vector<128x32xbf16>, vector<16x32xf32> -> vector<16x32xf32>
    %c0_67 = arith.constant 0 : index
    %c0_68 = arith.constant 0 : index
    %c0_69 = arith.constant 0 : index
    %172 = vector.load %arg12[%c0_67, %c0_68, %c0_69] : memref<2x1x32xf32, #tpu.memory_space<vmem>>, vector<1x1x32xf32>
    %173 = vector.shape_cast %172 : vector<1x1x32xf32> to vector<1x32xf32>
    %174 = vector.broadcast %173 : vector<1x32xf32> to vector<16x32xf32>
    %175 = arith.addf %171, %174 : vector<16x32xf32>
    %176 = arith.addf %128, %175 : vector<16x32xf32>
    %cst_70 = arith.constant dense<0.000000e+00> : vector<16xf32>
    %177 = vector.multi_reduction <add>, %176, %cst_70 [1] : vector<16x32xf32> to vector<16xf32>
    %178 = vector.shape_cast %177 : vector<16xf32> to vector<16x1xf32>
    %cst_71 = arith.constant 3.200000e+01 : f32
    %179 = vector.broadcast %cst_71 : f32 to vector<16x1xf32>
    %180 = arith.divf %178, %179 : vector<16x1xf32>
    %181 = vector.broadcast %180 : vector<16x1xf32> to vector<16x32xf32>
    %182 = arith.subf %176, %181 : vector<16x32xf32>
    %183 = arith.mulf %182, %182 : vector<16x32xf32>
    %cst_72 = arith.constant dense<0.000000e+00> : vector<16xf32>
    %184 = vector.multi_reduction <add>, %183, %cst_72 [1] : vector<16x32xf32> to vector<16xf32>
    %185 = vector.shape_cast %184 : vector<16xf32> to vector<16x1xf32>
    %cst_73 = arith.constant 3.200000e+01 : f32
    %186 = vector.broadcast %cst_73 : f32 to vector<16x1xf32>
    %187 = arith.divf %185, %186 : vector<16x1xf32>
    %188 = vector.broadcast %180 : vector<16x1xf32> to vector<16x32xf32>
    %189 = arith.subf %176, %188 : vector<16x32xf32>
    %cst_74 = arith.constant 9.99999974E-6 : f32
    %190 = vector.broadcast %cst_74 : f32 to vector<16x1xf32>
    %191 = arith.addf %187, %190 : vector<16x1xf32>
    %192 = math.rsqrt %191 : vector<16x1xf32>
    %193 = vector.broadcast %192 : vector<16x1xf32> to vector<16x32xf32>
    %194 = arith.mulf %189, %193 : vector<16x32xf32>
    %195 = arith.truncf %194 : vector<16x32xf32> to vector<16x32xbf16>
    %c1 = arith.constant 1 : index
    %c0_75 = arith.constant 0 : index
    %c0_76 = arith.constant 0 : index
    %196 = vector.load %arg5[%c1, %c0_75, %c0_76] : memref<2x32x96xbf16, #tpu.memory_space<vmem>>, vector<1x32x96xbf16>
    %197 = vector.shape_cast %196 : vector<1x32x96xbf16> to vector<32x96xbf16>
    %cst_77 = arith.constant dense<0.000000e+00> : vector<16x96xf32>
    %198 = tpu.matmul %195, %197, %cst_77 {dimension_numbers = #tpu.dot_dimension_numbers<[1], [0], [0], [1], [0, 0, 1, 1], [], []>} : vector<16x32xbf16>, vector<32x96xbf16>, vector<16x96xf32> -> vector<16x96xf32>
    %c1_78 = arith.constant 1 : index
    %c0_79 = arith.constant 0 : index
    %c0_80 = arith.constant 0 : index
    %199 = vector.load %arg6[%c1_78, %c0_79, %c0_80] : memref<2x1x96xf32, #tpu.memory_space<vmem>>, vector<1x1x96xf32>
    %200 = vector.shape_cast %199 : vector<1x1x96xf32> to vector<1x96xf32>
    %201 = vector.broadcast %200 : vector<1x96xf32> to vector<16x96xf32>
    %202 = arith.addf %198, %201 : vector<16x96xf32>
    %203 = vector.shape_cast %202 : vector<16x96xf32> to vector<2x8x96xf32>
    %204 = vector.extract_strided_slice %203 {offsets = [0, 0, 0], sizes = [2, 8, 8], strides = [1, 1, 1]} : vector<2x8x96xf32> to vector<2x8x8xf32>
    %205 = arith.truncf %204 : vector<2x8x8xf32> to vector<2x8x8xbf16>
    %206 = vector.extract_strided_slice %203 {offsets = [0, 0, 32], sizes = [2, 8, 8], strides = [1, 1, 1]} : vector<2x8x96xf32> to vector<2x8x8xf32>
    %207 = arith.truncf %206 : vector<2x8x8xf32> to vector<2x8x8xbf16>
    %208 = vector.extract_strided_slice %203 {offsets = [0, 0, 64], sizes = [2, 8, 8], strides = [1, 1, 1]} : vector<2x8x96xf32> to vector<2x8x8xf32>
    %209 = arith.truncf %208 : vector<2x8x8xf32> to vector<2x8x8xbf16>
    "tpu.trace_start"() <{level = 10 : i32, message = "bqd,bkd->bqk"}> : () -> ()
    %cst_81 = arith.constant dense<0.000000e+00> : vector<2x8x8xf32>
    %210 = tpu.matmul %205, %207, %cst_81 {dimension_numbers = #tpu.dot_dimension_numbers<[2], [2], [1], [1], [0, 0, 0, 1, 1, 1], [0], [0]>} : vector<2x8x8xbf16>, vector<2x8x8xbf16>, vector<2x8x8xf32> -> vector<2x8x8xf32>
    "tpu.trace_stop"() : () -> ()
    %cst_82 = arith.constant 0.353553385 : f32
    %211 = vector.broadcast %cst_82 : f32 to vector<2x8x8xf32>
    %212 = arith.mulf %210, %211 : vector<2x8x8xf32>
    %213 = arith.addf %212, %6 : vector<2x8x8xf32>
    %cst_83 = arith.constant dense<0xFF800000> : vector<2x8xf32>
    %214 = vector.multi_reduction <maximumf>, %213, %cst_83 [2] : vector<2x8x8xf32> to vector<2x8xf32>
    %215 = vector.shape_cast %214 : vector<2x8xf32> to vector<2x8x1xf32>
    %216 = vector.broadcast %215 : vector<2x8x1xf32> to vector<2x8x8xf32>
    %217 = arith.subf %213, %216 : vector<2x8x8xf32>
    %218 = math.exp %217 : vector<2x8x8xf32>
    %cst_84 = arith.constant dense<0.000000e+00> : vector<2x8xf32>
    %219 = vector.multi_reduction <add>, %218, %cst_84 [2] : vector<2x8x8xf32> to vector<2x8xf32>
    %220 = vector.shape_cast %219 : vector<2x8xf32> to vector<2x8x1xf32>
    %221 = vector.broadcast %220 : vector<2x8x1xf32> to vector<2x8x8xf32>
    %222 = arith.divf %218, %221 : vector<2x8x8xf32>
    %223 = arith.truncf %222 : vector<2x8x8xf32> to vector<2x8x8xbf16>
    "tpu.trace_start"() <{level = 10 : i32, message = "bqk,bkd->bqd"}> : () -> ()
    %cst_85 = arith.constant dense<0.000000e+00> : vector<2x8x8xf32>
    %224 = tpu.matmul %223, %209, %cst_85 {dimension_numbers = #tpu.dot_dimension_numbers<[2], [1], [1], [2], [0, 0, 0, 1, 1, 2], [0], [0]>} : vector<2x8x8xbf16>, vector<2x8x8xbf16>, vector<2x8x8xf32> -> vector<2x8x8xf32>
    "tpu.trace_stop"() : () -> ()
    %225 = vector.extract_strided_slice %203 {offsets = [0, 0, 8], sizes = [2, 8, 8], strides = [1, 1, 1]} : vector<2x8x96xf32> to vector<2x8x8xf32>
    %226 = arith.truncf %225 : vector<2x8x8xf32> to vector<2x8x8xbf16>
    %227 = vector.extract_strided_slice %203 {offsets = [0, 0, 40], sizes = [2, 8, 8], strides = [1, 1, 1]} : vector<2x8x96xf32> to vector<2x8x8xf32>
    %228 = arith.truncf %227 : vector<2x8x8xf32> to vector<2x8x8xbf16>
    %229 = vector.extract_strided_slice %203 {offsets = [0, 0, 72], sizes = [2, 8, 8], strides = [1, 1, 1]} : vector<2x8x96xf32> to vector<2x8x8xf32>
    %230 = arith.truncf %229 : vector<2x8x8xf32> to vector<2x8x8xbf16>
    "tpu.trace_start"() <{level = 10 : i32, message = "bqd,bkd->bqk"}> : () -> ()
    %cst_86 = arith.constant dense<0.000000e+00> : vector<2x8x8xf32>
    %231 = tpu.matmul %226, %228, %cst_86 {dimension_numbers = #tpu.dot_dimension_numbers<[2], [2], [1], [1], [0, 0, 0, 1, 1, 1], [0], [0]>} : vector<2x8x8xbf16>, vector<2x8x8xbf16>, vector<2x8x8xf32> -> vector<2x8x8xf32>
    "tpu.trace_stop"() : () -> ()
    %cst_87 = arith.constant 0.353553385 : f32
    %232 = vector.broadcast %cst_87 : f32 to vector<2x8x8xf32>
    %233 = arith.mulf %231, %232 : vector<2x8x8xf32>
    %234 = arith.addf %233, %6 : vector<2x8x8xf32>
    %cst_88 = arith.constant dense<0xFF800000> : vector<2x8xf32>
    %235 = vector.multi_reduction <maximumf>, %234, %cst_88 [2] : vector<2x8x8xf32> to vector<2x8xf32>
    %236 = vector.shape_cast %235 : vector<2x8xf32> to vector<2x8x1xf32>
    %237 = vector.broadcast %236 : vector<2x8x1xf32> to vector<2x8x8xf32>
    %238 = arith.subf %234, %237 : vector<2x8x8xf32>
    %239 = math.exp %238 : vector<2x8x8xf32>
    %cst_89 = arith.constant dense<0.000000e+00> : vector<2x8xf32>
    %240 = vector.multi_reduction <add>, %239, %cst_89 [2] : vector<2x8x8xf32> to vector<2x8xf32>
    %241 = vector.shape_cast %240 : vector<2x8xf32> to vector<2x8x1xf32>
    %242 = vector.broadcast %241 : vector<2x8x1xf32> to vector<2x8x8xf32>
    %243 = arith.divf %239, %242 : vector<2x8x8xf32>
    %244 = arith.truncf %243 : vector<2x8x8xf32> to vector<2x8x8xbf16>
    "tpu.trace_start"() <{level = 10 : i32, message = "bqk,bkd->bqd"}> : () -> ()
    %cst_90 = arith.constant dense<0.000000e+00> : vector<2x8x8xf32>
    %245 = tpu.matmul %244, %230, %cst_90 {dimension_numbers = #tpu.dot_dimension_numbers<[2], [1], [1], [2], [0, 0, 0, 1, 1, 2], [0], [0]>} : vector<2x8x8xbf16>, vector<2x8x8xbf16>, vector<2x8x8xf32> -> vector<2x8x8xf32>
    "tpu.trace_stop"() : () -> ()
    %246 = vector.extract_strided_slice %203 {offsets = [0, 0, 16], sizes = [2, 8, 8], strides = [1, 1, 1]} : vector<2x8x96xf32> to vector<2x8x8xf32>
    %247 = arith.truncf %246 : vector<2x8x8xf32> to vector<2x8x8xbf16>
    %248 = vector.extract_strided_slice %203 {offsets = [0, 0, 48], sizes = [2, 8, 8], strides = [1, 1, 1]} : vector<2x8x96xf32> to vector<2x8x8xf32>
    %249 = arith.truncf %248 : vector<2x8x8xf32> to vector<2x8x8xbf16>
    %250 = vector.extract_strided_slice %203 {offsets = [0, 0, 80], sizes = [2, 8, 8], strides = [1, 1, 1]} : vector<2x8x96xf32> to vector<2x8x8xf32>
    %251 = arith.truncf %250 : vector<2x8x8xf32> to vector<2x8x8xbf16>
    "tpu.trace_start"() <{level = 10 : i32, message = "bqd,bkd->bqk"}> : () -> ()
    %cst_91 = arith.constant dense<0.000000e+00> : vector<2x8x8xf32>
    %252 = tpu.matmul %247, %249, %cst_91 {dimension_numbers = #tpu.dot_dimension_numbers<[2], [2], [1], [1], [0, 0, 0, 1, 1, 1], [0], [0]>} : vector<2x8x8xbf16>, vector<2x8x8xbf16>, vector<2x8x8xf32> -> vector<2x8x8xf32>
    "tpu.trace_stop"() : () -> ()
    %cst_92 = arith.constant 0.353553385 : f32
    %253 = vector.broadcast %cst_92 : f32 to vector<2x8x8xf32>
    %254 = arith.mulf %252, %253 : vector<2x8x8xf32>
    %255 = arith.addf %254, %6 : vector<2x8x8xf32>
    %cst_93 = arith.constant dense<0xFF800000> : vector<2x8xf32>
    %256 = vector.multi_reduction <maximumf>, %255, %cst_93 [2] : vector<2x8x8xf32> to vector<2x8xf32>
    %257 = vector.shape_cast %256 : vector<2x8xf32> to vector<2x8x1xf32>
    %258 = vector.broadcast %257 : vector<2x8x1xf32> to vector<2x8x8xf32>
    %259 = arith.subf %255, %258 : vector<2x8x8xf32>
    %260 = math.exp %259 : vector<2x8x8xf32>
    %cst_94 = arith.constant dense<0.000000e+00> : vector<2x8xf32>
    %261 = vector.multi_reduction <add>, %260, %cst_94 [2] : vector<2x8x8xf32> to vector<2x8xf32>
    %262 = vector.shape_cast %261 : vector<2x8xf32> to vector<2x8x1xf32>
    %263 = vector.broadcast %262 : vector<2x8x1xf32> to vector<2x8x8xf32>
    %264 = arith.divf %260, %263 : vector<2x8x8xf32>
    %265 = arith.truncf %264 : vector<2x8x8xf32> to vector<2x8x8xbf16>
    "tpu.trace_start"() <{level = 10 : i32, message = "bqk,bkd->bqd"}> : () -> ()
    %cst_95 = arith.constant dense<0.000000e+00> : vector<2x8x8xf32>
    %266 = tpu.matmul %265, %251, %cst_95 {dimension_numbers = #tpu.dot_dimension_numbers<[2], [1], [1], [2], [0, 0, 0, 1, 1, 2], [0], [0]>} : vector<2x8x8xbf16>, vector<2x8x8xbf16>, vector<2x8x8xf32> -> vector<2x8x8xf32>
    "tpu.trace_stop"() : () -> ()
    %267 = vector.extract_strided_slice %203 {offsets = [0, 0, 24], sizes = [2, 8, 8], strides = [1, 1, 1]} : vector<2x8x96xf32> to vector<2x8x8xf32>
    %268 = arith.truncf %267 : vector<2x8x8xf32> to vector<2x8x8xbf16>
    %269 = vector.extract_strided_slice %203 {offsets = [0, 0, 56], sizes = [2, 8, 8], strides = [1, 1, 1]} : vector<2x8x96xf32> to vector<2x8x8xf32>
    %270 = arith.truncf %269 : vector<2x8x8xf32> to vector<2x8x8xbf16>
    %271 = vector.extract_strided_slice %203 {offsets = [0, 0, 88], sizes = [2, 8, 8], strides = [1, 1, 1]} : vector<2x8x96xf32> to vector<2x8x8xf32>
    %272 = arith.truncf %271 : vector<2x8x8xf32> to vector<2x8x8xbf16>
    "tpu.trace_start"() <{level = 10 : i32, message = "bqd,bkd->bqk"}> : () -> ()
    %cst_96 = arith.constant dense<0.000000e+00> : vector<2x8x8xf32>
    %273 = tpu.matmul %268, %270, %cst_96 {dimension_numbers = #tpu.dot_dimension_numbers<[2], [2], [1], [1], [0, 0, 0, 1, 1, 1], [0], [0]>} : vector<2x8x8xbf16>, vector<2x8x8xbf16>, vector<2x8x8xf32> -> vector<2x8x8xf32>
    "tpu.trace_stop"() : () -> ()
    %cst_97 = arith.constant 0.353553385 : f32
    %274 = vector.broadcast %cst_97 : f32 to vector<2x8x8xf32>
    %275 = arith.mulf %273, %274 : vector<2x8x8xf32>
    %276 = arith.addf %275, %6 : vector<2x8x8xf32>
    %cst_98 = arith.constant dense<0xFF800000> : vector<2x8xf32>
    %277 = vector.multi_reduction <maximumf>, %276, %cst_98 [2] : vector<2x8x8xf32> to vector<2x8xf32>
    %278 = vector.shape_cast %277 : vector<2x8xf32> to vector<2x8x1xf32>
    %279 = vector.broadcast %278 : vector<2x8x1xf32> to vector<2x8x8xf32>
    %280 = arith.subf %276, %279 : vector<2x8x8xf32>
    %281 = math.exp %280 : vector<2x8x8xf32>
    %cst_99 = arith.constant dense<0.000000e+00> : vector<2x8xf32>
    %282 = vector.multi_reduction <add>, %281, %cst_99 [2] : vector<2x8x8xf32> to vector<2x8xf32>
    %283 = vector.shape_cast %282 : vector<2x8xf32> to vector<2x8x1xf32>
    %284 = vector.broadcast %283 : vector<2x8x1xf32> to vector<2x8x8xf32>
    %285 = arith.divf %281, %284 : vector<2x8x8xf32>
    %286 = arith.truncf %285 : vector<2x8x8xf32> to vector<2x8x8xbf16>
    "tpu.trace_start"() <{level = 10 : i32, message = "bqk,bkd->bqd"}> : () -> ()
    %cst_100 = arith.constant dense<0.000000e+00> : vector<2x8x8xf32>
    %287 = tpu.matmul %286, %272, %cst_100 {dimension_numbers = #tpu.dot_dimension_numbers<[2], [1], [1], [2], [0, 0, 0, 1, 1, 2], [0], [0]>} : vector<2x8x8xbf16>, vector<2x8x8xbf16>, vector<2x8x8xf32> -> vector<2x8x8xf32>
    "tpu.trace_stop"() : () -> ()
    %288 = tpu.concatenate %224, %245, %266, %287 in 2 : vector<2x8x8xf32>, vector<2x8x8xf32>, vector<2x8x8xf32>, vector<2x8x8xf32> -> vector<2x8x32xf32>
    %289 = vector.shape_cast %288 : vector<2x8x32xf32> to vector<16x32xf32>
    %290 = arith.truncf %289 : vector<16x32xf32> to vector<16x32xbf16>
    %c1_101 = arith.constant 1 : index
    %c0_102 = arith.constant 0 : index
    %c0_103 = arith.constant 0 : index
    %291 = vector.load %arg7[%c1_101, %c0_102, %c0_103] : memref<2x32x32xbf16, #tpu.memory_space<vmem>>, vector<1x32x32xbf16>
    %292 = vector.shape_cast %291 : vector<1x32x32xbf16> to vector<32x32xbf16>
    %cst_104 = arith.constant dense<0.000000e+00> : vector<16x32xf32>
    %293 = tpu.matmul %290, %292, %cst_104 {dimension_numbers = #tpu.dot_dimension_numbers<[1], [0], [0], [1], [0, 0, 1, 1], [], []>} : vector<16x32xbf16>, vector<32x32xbf16>, vector<16x32xf32> -> vector<16x32xf32>
    %c1_105 = arith.constant 1 : index
    %c0_106 = arith.constant 0 : index
    %c0_107 = arith.constant 0 : index
    %294 = vector.load %arg8[%c1_105, %c0_106, %c0_107] : memref<2x1x32xf32, #tpu.memory_space<vmem>>, vector<1x1x32xf32>
    %295 = vector.shape_cast %294 : vector<1x1x32xf32> to vector<1x32xf32>
    %296 = vector.broadcast %295 : vector<1x32xf32> to vector<16x32xf32>
    %297 = arith.addf %293, %296 : vector<16x32xf32>
    %298 = arith.addf %176, %297 : vector<16x32xf32>
    %cst_108 = arith.constant dense<0.000000e+00> : vector<16xf32>
    %299 = vector.multi_reduction <add>, %298, %cst_108 [1] : vector<16x32xf32> to vector<16xf32>
    %300 = vector.shape_cast %299 : vector<16xf32> to vector<16x1xf32>
    %cst_109 = arith.constant 3.200000e+01 : f32
    %301 = vector.broadcast %cst_109 : f32 to vector<16x1xf32>
    %302 = arith.divf %300, %301 : vector<16x1xf32>
    %303 = vector.broadcast %302 : vector<16x1xf32> to vector<16x32xf32>
    %304 = arith.subf %298, %303 : vector<16x32xf32>
    %305 = arith.mulf %304, %304 : vector<16x32xf32>
    %cst_110 = arith.constant dense<0.000000e+00> : vector<16xf32>
    %306 = vector.multi_reduction <add>, %305, %cst_110 [1] : vector<16x32xf32> to vector<16xf32>
    %307 = vector.shape_cast %306 : vector<16xf32> to vector<16x1xf32>
    %cst_111 = arith.constant 3.200000e+01 : f32
    %308 = vector.broadcast %cst_111 : f32 to vector<16x1xf32>
    %309 = arith.divf %307, %308 : vector<16x1xf32>
    %310 = vector.broadcast %302 : vector<16x1xf32> to vector<16x32xf32>
    %311 = arith.subf %298, %310 : vector<16x32xf32>
    %cst_112 = arith.constant 9.99999974E-6 : f32
    %312 = vector.broadcast %cst_112 : f32 to vector<16x1xf32>
    %313 = arith.addf %309, %312 : vector<16x1xf32>
    %314 = math.rsqrt %313 : vector<16x1xf32>
    %315 = vector.broadcast %314 : vector<16x1xf32> to vector<16x32xf32>
    %316 = arith.mulf %311, %315 : vector<16x32xf32>
    %317 = arith.truncf %316 : vector<16x32xf32> to vector<16x32xbf16>
    %c1_113 = arith.constant 1 : index
    %c0_114 = arith.constant 0 : index
    %c0_115 = arith.constant 0 : index
    %318 = vector.load %arg9[%c1_113, %c0_114, %c0_115] : memref<2x32x128xbf16, #tpu.memory_space<vmem>>, vector<1x32x128xbf16>
    %319 = vector.shape_cast %318 : vector<1x32x128xbf16> to vector<32x128xbf16>
    %cst_116 = arith.constant dense<0.000000e+00> : vector<16x128xf32>
    %320 = tpu.matmul %317, %319, %cst_116 {dimension_numbers = #tpu.dot_dimension_numbers<[1], [0], [0], [1], [0, 0, 1, 1], [], []>} : vector<16x32xbf16>, vector<32x128xbf16>, vector<16x128xf32> -> vector<16x128xf32>
    %c1_117 = arith.constant 1 : index
    %c0_118 = arith.constant 0 : index
    %c0_119 = arith.constant 0 : index
    %321 = vector.load %arg10[%c1_117, %c0_118, %c0_119] : memref<2x1x128xf32, #tpu.memory_space<vmem>>, vector<1x1x128xf32>
    %322 = vector.shape_cast %321 : vector<1x1x128xf32> to vector<1x128xf32>
    %323 = vector.broadcast %322 : vector<1x128xf32> to vector<16x128xf32>
    %324 = arith.addf %320, %323 : vector<16x128xf32>
    %cst_120 = arith.constant 5.000000e-01 : f32
    %325 = vector.broadcast %cst_120 : f32 to vector<16x128xf32>
    %326 = arith.mulf %325, %324 : vector<16x128xf32>
    %cst_121 = arith.constant 4.471500e-02 : f32
    %327 = vector.broadcast %cst_121 : f32 to vector<16x128xf32>
    %328 = arith.mulf %327, %324 : vector<16x128xf32>
    %329 = arith.mulf %328, %324 : vector<16x128xf32>
    %330 = arith.mulf %329, %324 : vector<16x128xf32>
    %331 = arith.addf %324, %330 : vector<16x128xf32>
    %cst_122 = arith.constant 0.797884583 : f32
    %332 = vector.broadcast %cst_122 : f32 to vector<16x128xf32>
    %333 = arith.mulf %332, %331 : vector<16x128xf32>
    %334 = math.tanh %333 : vector<16x128xf32>
    %cst_123 = arith.constant 1.000000e+00 : f32
    %335 = vector.broadcast %cst_123 : f32 to vector<16x128xf32>
    %336 = arith.addf %335, %334 : vector<16x128xf32>
    %337 = arith.mulf %326, %336 : vector<16x128xf32>
    %338 = arith.truncf %337 : vector<16x128xf32> to vector<16x128xbf16>
    %c1_124 = arith.constant 1 : index
    %c0_125 = arith.constant 0 : index
    %c0_126 = arith.constant 0 : index
    %339 = vector.load %arg11[%c1_124, %c0_125, %c0_126] : memref<2x128x32xbf16, #tpu.memory_space<vmem>>, vector<1x128x32xbf16>
    %340 = vector.shape_cast %339 : vector<1x128x32xbf16> to vector<128x32xbf16>
    %cst_127 = arith.constant dense<0.000000e+00> : vector<16x32xf32>
    %341 = tpu.matmul %338, %340, %cst_127 {dimension_numbers = #tpu.dot_dimension_numbers<[1], [0], [0], [1], [0, 0, 1, 1], [], []>} : vector<16x128xbf16>, vector<128x32xbf16>, vector<16x32xf32> -> vector<16x32xf32>
    %c1_128 = arith.constant 1 : index
    %c0_129 = arith.constant 0 : index
    %c0_130 = arith.constant 0 : index
    %342 = vector.load %arg12[%c1_128, %c0_129, %c0_130] : memref<2x1x32xf32, #tpu.memory_space<vmem>>, vector<1x1x32xf32>
    %343 = vector.shape_cast %342 : vector<1x1x32xf32> to vector<1x32xf32>
    %344 = vector.broadcast %343 : vector<1x32xf32> to vector<16x32xf32>
    %345 = arith.addf %341, %344 : vector<16x32xf32>
    %346 = arith.addf %298, %345 : vector<16x32xf32>
    %cst_131 = arith.constant dense<0.000000e+00> : vector<16xf32>
    %347 = vector.multi_reduction <add>, %346, %cst_131 [1] : vector<16x32xf32> to vector<16xf32>
    %348 = vector.shape_cast %347 : vector<16xf32> to vector<16x1xf32>
    %cst_132 = arith.constant 3.200000e+01 : f32
    %349 = vector.broadcast %cst_132 : f32 to vector<16x1xf32>
    %350 = arith.divf %348, %349 : vector<16x1xf32>
    %351 = vector.broadcast %350 : vector<16x1xf32> to vector<16x32xf32>
    %352 = arith.subf %346, %351 : vector<16x32xf32>
    %353 = arith.mulf %352, %352 : vector<16x32xf32>
    %cst_133 = arith.constant dense<0.000000e+00> : vector<16xf32>
    %354 = vector.multi_reduction <add>, %353, %cst_133 [1] : vector<16x32xf32> to vector<16xf32>
    %355 = vector.shape_cast %354 : vector<16xf32> to vector<16x1xf32>
    %cst_134 = arith.constant 3.200000e+01 : f32
    %356 = vector.broadcast %cst_134 : f32 to vector<16x1xf32>
    %357 = arith.divf %355, %356 : vector<16x1xf32>
    %358 = vector.broadcast %350 : vector<16x1xf32> to vector<16x32xf32>
    %359 = arith.subf %346, %358 : vector<16x32xf32>
    %cst_135 = arith.constant 9.99999974E-6 : f32
    %360 = vector.broadcast %cst_135 : f32 to vector<16x1xf32>
    %361 = arith.addf %357, %360 : vector<16x1xf32>
    %362 = math.rsqrt %361 : vector<16x1xf32>
    %363 = vector.broadcast %362 : vector<16x1xf32> to vector<16x32xf32>
    %364 = arith.mulf %359, %363 : vector<16x32xf32>
    %365 = arith.truncf %364 : vector<16x32xf32> to vector<16x32xbf16>
    %c0_136 = arith.constant 0 : index
    %c0_137 = arith.constant 0 : index
    %366 = vector.load %arg13[%c0_136, %c0_137] : memref<32x32xbf16, #tpu.memory_space<vmem>>, vector<32x32xbf16>
    %cst_138 = arith.constant dense<0.000000e+00> : vector<16x32xf32>
    %367 = tpu.matmul %365, %366, %cst_138 {dimension_numbers = #tpu.dot_dimension_numbers<[1], [0], [0], [1], [0, 0, 1, 1], [], []>} : vector<16x32xbf16>, vector<32x32xbf16>, vector<16x32xf32> -> vector<16x32xf32>
    %c0_139 = arith.constant 0 : index
    %c0_140 = arith.constant 0 : index
    %368 = vector.load %arg14[%c0_139, %c0_140] : memref<1x32xf32, #tpu.memory_space<vmem>>, vector<1x32xf32>
    %369 = vector.broadcast %368 : vector<1x32xf32> to vector<16x32xf32>
    %370 = arith.addf %367, %369 : vector<16x32xf32>
    %371 = tpu.iota {dimensions = array<i32: 1>} : vector<16x32xi32>
    %c16_i32 = arith.constant 16 : i32
    %372 = vector.broadcast %c16_i32 : i32 to vector<16x32xi32>
    %373 = arith.cmpi sge, %371, %372 : vector<16x32xi32>
    %cst_141 = arith.constant 5.000000e-01 : f32
    %374 = vector.broadcast %cst_141 : f32 to vector<16x32xf32>
    %375 = arith.mulf %374, %370 : vector<16x32xf32>
    %376 = math.exp %375 : vector<16x32xf32>
    %377 = arith.select %373, %376, %370 : vector<16x32xi1>, vector<16x32xf32>
    %c0_142 = arith.constant 0 : index
    %c0_143 = arith.constant 0 : index
    %378 = vector.load %arg15[%c0_142, %c0_143] : memref<16x32xf32, #tpu.memory_space<vmem>>, vector<16x32xf32>
    tpu.vector_store %arg15[%c0_142, %c0_143], %377 {strides = array<i32>} : memref<16x32xf32, #tpu.memory_space<vmem>>, vector<16x32xf32>,
    %379 = arith.mulf %376, %376 : vector<16x32xf32>
    %380 = arith.subf %379, %370 : vector<16x32xf32>
    %cst_144 = arith.constant 1.000000e+00 : f32
    %381 = vector.broadcast %cst_144 : f32 to vector<16x32xf32>
    %382 = arith.subf %380, %381 : vector<16x32xf32>
    %383 = arith.mulf %370, %370 : vector<16x32xf32>
    %384 = arith.select %373, %382, %383 : vector<16x32xi1>, vector<16x32xf32>
    %cst_145 = arith.constant dense<0.000000e+00> : vector<16xf32>
    %385 = vector.multi_reduction <add>, %384, %cst_145 [1] : vector<16x32xf32> to vector<16xf32>
    %386 = vector.shape_cast %385 : vector<16xf32> to vector<16x1xf32>
    %cst_146 = arith.constant 5.000000e-01 : f32
    %387 = vector.broadcast %cst_146 : f32 to vector<16x1xf32>
    %388 = arith.mulf %387, %386 : vector<16x1xf32>
    %cst_147 = arith.constant 6.250000e-02 : f32
    %389 = vector.broadcast %cst_147 : f32 to vector<16x1xf32>
    %390 = arith.mulf %388, %389 : vector<16x1xf32>
    %c0_148 = arith.constant 0 : index
    %c0_149 = arith.constant 0 : index
    %391 = vector.load %arg2[%c0_148, %c0_149] : memref<16x1xf32, #tpu.memory_space<vmem>>, vector<16x1xf32>
    %cst_150 = arith.constant 5.000000e-01 : f32
    %392 = vector.broadcast %cst_150 : f32 to vector<16x1xf32>
    %393 = arith.cmpf ogt, %391, %392 : vector<16x1xf32>
    %cst_151 = arith.constant 0.000000e+00 : f32
    %394 = vector.broadcast %cst_151 : f32 to vector<16x1xf32>
    %395 = arith.select %393, %390, %394 : vector<16x1xi1>, vector<16x1xf32>
    %396 = vector.shape_cast %391 : vector<16x1xf32> to vector<1x16x1xf32>
    %cst_152 = arith.constant dense<0.000000e+00> : vector<1xf32>
    %397 = vector.multi_reduction <add>, %396, %cst_152 [1, 2] : vector<1x16x1xf32> to vector<1xf32>
    %398 = vector.shape_cast %397 : vector<1xf32> to vector<1x1x1xf32>
    %399 = vector.extract %398[0, 0, 0] : f32 from vector<1x1x1xf32>
    %cst_153 = arith.constant 5.000000e-01 : f32
    %400 = vector.broadcast %cst_153 : f32 to vector<16x1xf32>
    %401 = arith.cmpf ogt, %395, %400 : vector<16x1xf32>
    %cst_154 = arith.constant 0.000000e+00 : f32
    %402 = vector.broadcast %cst_154 : f32 to vector<16x1xf32>
    %403 = arith.select %401, %395, %402 : vector<16x1xi1>, vector<16x1xf32>
    %404 = vector.shape_cast %403 : vector<16x1xf32> to vector<1x16x1xf32>
    %cst_155 = arith.constant dense<0.000000e+00> : vector<1xf32>
    %405 = vector.multi_reduction <add>, %404, %cst_155 [1, 2] : vector<1x16x1xf32> to vector<1xf32>
    %406 = vector.shape_cast %405 : vector<1xf32> to vector<1x1x1xf32>
    %407 = vector.extract %406[0, 0, 0] : f32 from vector<1x1x1xf32>
    %408 = arith.divf %407, %399 : f32
    %c0_156 = arith.constant 0 : index
    %c0_157 = arith.constant 0 : index
    %409 = memref.load %arg16[%c0_156, %c0_157] : memref<1x1xf32, #tpu.memory_space<smem>>
    memref.store %408, %arg16[%c0_156, %c0_157] : memref<1x1xf32, #tpu.memory_space<smem>>
    %410 = vector.shape_cast %395 : vector<16x1xf32> to vector<1x16x1xf32>
    %cst_158 = arith.constant dense<0.000000e+00> : vector<1xf32>
    %411 = vector.multi_reduction <add>, %410, %cst_158 [1, 2] : vector<1x16x1xf32> to vector<1xf32>
    %412 = vector.shape_cast %411 : vector<1xf32> to vector<1x1x1xf32>
    %413 = vector.extract %412[0, 0, 0] : f32 from vector<1x1x1xf32>
    %414 = arith.divf %413, %399 : f32
    %c0_159 = arith.constant 0 : index
    %c0_160 = arith.constant 0 : index
    %415 = memref.load %arg17[%c0_159, %c0_160] : memref<1x1xf32, #tpu.memory_space<smem>>
    memref.store %414, %arg17[%c0_159, %c0_160] : memref<1x1xf32, #tpu.memory_space<smem>>
    return
  }
}

</mosaic_0001>

<bundles_post_ra>
// kernel: sentence_gpt_forward.1
= control target key start
LH: loop header
LB: loop body
LE: loop exit
PB: predicated region body
PF: predicated region fallthrough
CT: control target
= control target key end

     0   :  { %s4487_s0 = inlined_call_operand.vmem [shape: f32[16,16], index: 0, kind: input, shape index: {}]   ;;  %s4488_s1 = inlined_call_operand.vmem [shape: f32[2,8,8], index: 1, kind: input, shape index: {}]   ;;  %s4489_s2 = inlined_call_operand.vmem [shape: f32[16,1], index: 2, kind: input, shape index: {}]   ;;  %s4490_s3 = inlined_call_operand.vmem [shape: bf16[16,32], index: 3, kind: input, shape index: {}]   ;;  %s4491_s4 = inlined_call_operand.vmem [shape: f32[16,32], index: 4, kind: input, shape index: {}]   ;;  %s4492_s5 = inlined_call_operand.vmem [shape: bf16[2,32,96], index: 5, kind: input, shape index: {}]   ;;  %s4493_s6 = inlined_call_operand.vmem [shape: f32[2,1,96], index: 6, kind: input, shape index: {}]   ;;  %s4494_s7 = inlined_call_operand.vmem [shape: bf16[2,32,32], index: 7, kind: input, shape index: {}]   ;;  %s4495_s8 = inlined_call_operand.vmem [shape: f32[2,1,32], index: 8, kind: input, shape index: {}]   ;;  %s4496_s9 = inlined_call_operand.vmem [shape: bf16[2,32,128], index: 9, kind: input, shape index: {}]   ;;  %s4497_s10 = inlined_call_operand.vmem [shape: f32[2,1,128], index: 10, kind: input, shape index: {}]   ;;  %s4498_s11 = inlined_call_operand.vmem [shape: bf16[2,128,32], index: 11, kind: input, shape index: {}]   ;;  %s4499_s12 = inlined_call_operand.vmem [shape: f32[2,1,32], index: 12, kind: input, shape index: {}]   ;;  %s4500_s13 = inlined_call_operand.vmem [shape: bf16[32,32], index: 13, kind: input, shape index: {}]   ;;  %s4501_s14 = inlined_call_operand.vmem [shape: f32[1,32], index: 14, kind: input, shape index: {}]   ;;  %s4502_s15 = inlined_call_operand.vmem [shape: f32[16,32], index: 15, kind: output, shape index: {0}]   ;;  %s4503_s16 = inlined_call_operand.hbm [shape: f32[1,1], index: 16, kind: output, shape index: {1}]   ;;  %s4504_s17 = inlined_call_operand.hbm [shape: f32[1,1], index: 17, kind: output, shape index: {2}]  }
   0x1   :  { %4516 = sst [smem:[#allocation8_spill]] %s4487_s0 }
   0x2   :  { %4517 = sst [smem:[#allocation9_spill]] %s4488_s1 }
   0x3   :  { %23 = vsyncpa [#allocation3], 0  ;;  %v3547_v0 = vld [vmem:[%s4490_s3] sm:$0xff]   ;;  %v3702_v1 = vmov 0.0   ;;  %s4518_s28 = sld [smem:[#allocation8_spill]]  ;;  %vm69_vm0 = vcmask 130048  }
   0x4   :  { %3197 = vmatprep.subr.bf16.mxu0 %v3702_v1  ;;  %3217 = vmatprep.subr.bf16.mxu1 %v3702_v1  ;;  %vm3703_vm1 = vmmov 0  }
   0x5   :  { %3198 = vmatpush3.bf16.msra.mxu0 %v3547_v0  ;;  %3199 = vmatprep.mubr.msk.bf16.mxu0 %vm3703_vm1, %v3702_v1 }
   0x6   :  { %3203 = vmatprep.subr.bf16.mxu0 %v3702_v1  ;;  %3219 = vmatprep.mubr.msk.bf16.mxu1 %vm3703_vm1, %v3702_v1 }
   0x9   :  { %v56_v2 = vld [vmem:[%s4518_s28] sm:$0xff]  ;;  %v57_v3 = vld [vmem:[%s4518_s28 + $0x8] sm:$0xff] }
   0xa   :  { %v58_v4 = vpack.c.bf16 %v57_v3, %v56_v2 }
   0xc   :  { %3200 = vmatmul.mubr.msk.bf16.vlgmr.msra.gmra.mrb[0].mxu0 %vm69_vm0, %v58_v4 }
   0xd   :  { %3207 = vmatprep.mubr.msk.bf16.mxu0 %vm3703_vm1, %v3702_v1 }
   0xe   :  { %24 = vsyncpa [#allocation5], 0  ;;  %v61_v5 = vld [vmem:[%s4491_s4] sm:$0xff]  ;;  %v62_v7 = vld [vmem:[%s4491_s4 + $0x8] sm:$0xff]  ;;  %vm116_vm2 = vcmask 261120   ;;  %s3704_s24 = smov 96  }
   0xf   :  { %v3548_v25 = vld [vmem:[%s4492_s5] sm:$0xff]   ;;  %v3549_v26 = vld [vmem:[%s4492_s5 + $0x8] sm:$0xff]   ;;  %vm217_vm3 = vcmask 64512   ;;  %s4519_s27 = sld [smem:[#allocation9_spill]]  ;;  %s3705_s0 = smov 64   ;;  %vm346_vm4 = vcmask 1043456  }
  0x10   :  { %3204 = vmatpush3.bf16.msra.mxu0 %v3548_v25  ;;  %v2980_v38 = vld [vmem:[%s4493_s6] ss:$0 sm:$0xff]  ;;  %s3706_s3 = smov 88   ;;  %s3707_s30 = smov 120   ;;  %vm1138_vm5 = vcmask 195584   ;;  %vm2896_vm7 = vcmask 7168  }
  0x11   :  { %3205 = vmatprep.subr.bf16.mxu0 %v3702_v1  ;;  %s3708_s18 = smov 56   ;;  %s3709_s19 = smov 80  }
  0x12   :  { %s3710_s4 = smov 112   ;;  %s3711_s1 = smov 48  }
  0x13   :  { %s4514_s20 = smov 72   ;;  %s4512_s21 = smov 104  }
  0x14   :  { %3206 = vmatpush3.bf16.msra.mxu0 %v3549_v26  ;;  %s4510_s22 = smov 40   ;;  %s4509_s23 = smov 8  }
  0x15   :  { %3211 = vmatprep.subr.bf16.mxu0 %v3702_v1  ;;  %v3884_v52 = vld [vmem:[%s4519_s27] sm:$0xff]  ;;  %v3889_v57 = vld [vmem:[%s4519_s27 + $0x8] sm:$0xff]  ;;  %s4507_s25 = smov 16   ;;  %s4508_s26 = smov 24  }
  0xdf   :  { %v107_v6 = vpop.f32.mrb[0].mxu0 }
  0xe0   :  { %v3835_v8 = vadd.f32 %v107_v6, %v61_v5  ;;  %v3201_v9 = vpop.f32.mrb[1].mxu0 }
  0xe1   :  { %v110_v10 = vpop.f32.mrb[2].mxu0 }
  0xe2   :  { %v3837_v11 = vadd.f32 %v110_v10, %v62_v7  ;;  %v3202_v12 = vpop.f32.mrb[3].mxu0  ;;  %v117_v13 = vsel %vm116_vm2, %v3835_v8, 0.0 }
  0xe3   :  { %118 = vadd.xlane.f32.xlu0 %v117_v13 }
  0xe4   :  { %v120_v14 = vsel %vm116_vm2, %v3837_v11, 0.0 }
  0xe7   :  { %121 = vadd.xlane.f32.xlu0 %v120_v14 }
 0x170   :  { %v119_v15 = vpop.xlane.xlu0 %118 }
 0x171   :  { %v124_v16 = vmul.f32 0.03125, %v119_v15 }
 0x173   :  { %v126_v17 = vsub.f32 %v3835_v8, %v124_v16 }
 0x174   :  { %v122_v18 = vpop.xlane.xlu0 %121 }
 0x175   :  { %v125_v19 = vmul.f32 0.03125, %v122_v18  ;;  %v128_v20 = vmul.f32 %v126_v17, %v126_v17 }
 0x177   :  { %v127_v21 = vsub.f32 %v3837_v11, %v125_v19  ;;  %v130_v22 = vsel %vm116_vm2, %v128_v20, 0.0 }
 0x178   :  { %131 = vadd.xlane.f32.xlu1 %v130_v22 }
 0x179   :  { %v129_v23 = vmul.f32 %v127_v21, %v127_v21 }
 0x17b   :  { %v133_v24 = vsel %vm116_vm2, %v129_v23, 0.0 }
 0x17c   :  { %134 = vadd.xlane.f32.xlu1 %v133_v24 }
 0x205   :  { %v132_v27 = vpop.xlane.xlu1 %131 }
 0x206   :  { %v136_v28 = vmul.f32 0.03125, %v132_v27 }
 0x208   :  { %v138_v29 = vadd.f32 1e-05, %v136_v28 }
 0x209   :  { %v135_v30 = vpop.xlane.xlu1 %134 }
 0x20a   :  { %v137_v31 = vmul.f32 0.03125, %v135_v30  ;;  %3578 = vrsqrt.f32 %v138_v29 }
 0x20c   :  { %v139_v32 = vadd.f32 1e-05, %v137_v31 }
 0x20e   :  { %3580 = vrsqrt.f32 %v139_v32 }
 0x214   :  { %v3579_v33 = vpop.eup %3578 }
 0x215   :  { %v142_v35 = vmul.f32 %v3579_v33, %v126_v17 }
 0x218   :  { %v3581_v34 = vpop.eup %3580 }
 0x219   :  { %v143_v36 = vmul.f32 %v3581_v34, %v127_v21 }
 0x21b   :  { %v144_v37 = vpack.c.bf16 %v143_v36, %v142_v35 }
 0x21d   :  { %3208 = vmatmul.mubr.msk.bf16.vlgmr.msra.gmra.mrb[4].mxu0 %vm116_vm2, %v144_v37 }
 0x21e   :  { %3213 = vmatprep.mubr.msk.bf16.mxu0 %vm3703_vm1, %v3702_v1 }
 0x2f0   :  { %v205_v39 = vpop.f32.mrb[4].mxu0 }
 0x2f1   :  { %v206_v40 = vadd.f32 %v2980_v38, %v205_v39  ;;  %v3209_v41 = vpop.f32.mrb[5].mxu0 }
 0x2f2   :  { %v208_v42 = vpop.f32.mrb[6].mxu0 }
 0x2f3   :  { %v3861_v43 = vpack.c.bf16 %v206_v40, %v206_v40  ;;  %v209_v44 = vadd.f32 %v2980_v38, %v208_v42  ;;  %v3210_v45 = vpop.f32.mrb[7].mxu0 }
 0x2f5   :  { %v3863_v46 = vpack.c.bf16 %v209_v44, %v209_v44  ;;  %215 = vrot.lane.b32.xlu0 %v3861_v43, %s3704_s24 }
 0x2f7   :  { %265 = vrot.lane.b32.xlu1 %v3863_v46, %s3704_s24 }
 0x367   :  { %v216_v47 = vpop.permute.xlu0 %215 }
 0x368   :  { %v222_v48 = vsel %vm217_vm3, %v216_v47, 0 }
 0x369   :  { %3212 = vmatpush3.bf16.xpose.msra.mxu0 %v222_v48  ;;  %v266_v49 = vpop.permute.xlu1 %265 }
 0x36a   :  { %v271_v50 = vsel %vm217_vm3, %v266_v49, 0  ;;  %3223 = vmatprep.subr.bf16.mxu0 %v3702_v1 }
 0x36b   :  { %3218 = vmatpush3.bf16.xpose.msra.mxu1 %v271_v50 }
 0x36c   :  { %3229 = vmatprep.subr.bf16.mxu1 %v3702_v1 }
 0x370   :  { %3214 = vmatmul.mubr.msk.bf16.vlgmr.msra.gmra.mrb[8].mxu0 %vm217_vm3, %v3861_v43 }
 0x371   :  { %3225 = vmatprep.mubr.msk.bf16.mxu0 %vm3703_vm1, %v3702_v1 }
 0x372   :  { %3220 = vmatmul.mubr.msk.bf16.vlgmr.msra.gmra.mrb[0].mxu1 %vm217_vm3, %v3863_v46 }
 0x373   :  { %3231 = vmatprep.mubr.msk.bf16.mxu1 %vm3703_vm1, %v3702_v1 }
 0x443   :  { %v258_v51 = vpop.f32.mrb[8].mxu0 }
 0x444   :  { %v313_v53 = vmul.f32 0.35355338, %v258_v51  ;;  %v3215_v54 = vpop.f32.mrb[9].mxu0 }
 0x445   :  { %v261_v55 = vpop.f32.mrb[10].mxu0  ;;  %v307_v56 = vpop.f32.mrb[0].mxu1 }
 0x446   :  { %v314_v58 = vmul.f32 0.35355338, %v307_v56  ;;  %v3216_v59 = vpop.f32.mrb[11].mxu0  ;;  %v3221_v60 = vpop.f32.mrb[1].mxu1  ;;  %v315_v61 = vadd.f32 %v313_v53, %v3884_v52 }
 0x447   :  { %v310_v62 = vpop.f32.mrb[2].mxu1 }
 0x448   :  { %v3222_v63 = vpop.f32.mrb[3].mxu1  ;;  %v317_v0 = vsel %vm217_vm3, %v315_v61, -inf  ;;  %v316_v2 = vadd.f32 %v314_v58, %v3889_v57 }
 0x449   :  { %318 = vmax.xlane.f32.xlu1 %v317_v0 }
 0x44a   :  { %v320_v3 = vsel %vm217_vm3, %v316_v2, -inf }
 0x44b   :  { %321 = vmax.xlane.f32.xlu0 %v320_v3 }
 0x45a   :  { %390 = vrot.lane.b32.xlu1 %v3863_v46, %s3705_s0 }
 0x45e   :  { %440 = vrot.lane.b32.xlu1 %v3861_v43, %s3706_s3 }
 0x4d6   :  { %v319_v4 = vpop.xlane.xlu1 %318 }
 0x4d7   :  { %v323_v5 = vsub.f32 %v315_v61, %v319_v4 }
 0x4d8   :  { %v322_v6 = vpop.xlane.xlu0 %321 }
 0x4d9   :  { %v325_v7 = vmul.f32 1.442695, %v323_v5  ;;  %v324_v9 = vsub.f32 %v316_v2, %v322_v6 }
 0x4da   :  { %v391_v10 = vpop.permute.xlu1 %390 }
 0x4db   :  { %3582 = vpow2.f32 %v325_v7  ;;  %v327_v12 = vmul.f32 1.442695, %v324_v9  ;;  %v396_v13 = vsel %vm346_vm4, %v391_v10, 0 }
 0x4dc   :  { %3230 = vmatpush3.bf16.msra.mxu1 %v396_v13 }
 0x4dd   :  { %3584 = vpow2.f32 %v327_v12  ;;  %3241 = vmatprep.subr.bf16.mxu1 %v3702_v1 }
 0x4de   :  { %v441_v18 = vpop.permute.xlu1 %440 }
 0x4df   :  { %v446_v29 = vsel %vm217_vm3, %v441_v18, 0 }
 0x4e5   :  { %v3583_v14 = vpop.eup %3582 }
 0x4e6   :  { %v329_v15 = vsel %vm217_vm3, %v3583_v14, 0.0 }
 0x4e7   :  { %v3585_v16 = vpop.eup %3584  ;;  %330 = vadd.xlane.f32.xlu0 %v329_v15 }
 0x4e8   :  { %v332_v17 = vsel %vm217_vm3, %v3585_v16, 0.0 }
 0x4e9   :  { %333 = vadd.xlane.f32.xlu1 %v332_v17 }
 0x4fa   :  { %490 = vrot.lane.b32.xlu1 %v3863_v46, %s3706_s3 }
 0x4fd   :  { %341 = vrot.lane.b32.xlu0 %v3861_v43, %s3705_s0 }
 0x4fe   :  { %488 = vrot.lane.b32.xlu1 %v3863_v46, %s3707_s30 }
 0x501   :  { %438 = vrot.lane.b32.xlu0 %v3861_v43, %s3707_s30 }
 0x574   :  { %v331_v19 = vpop.xlane.xlu0 %330 }
 0x575   :  { %3586 = vrcp.f32 %v331_v19 }
 0x576   :  { %v334_v20 = vpop.xlane.xlu1 %333 }
 0x577   :  { %3588 = vrcp.f32 %v334_v20 }
 0x578   :  { %v342_v21 = vpop.permute.xlu0 %341 }
 0x579   :  { %v348_v22 = vsel %vm346_vm4, %v342_v21, 0 }
 0x57a   :  { %3224 = vmatpush3.bf16.msra.mxu0 %v348_v22  ;;  %v491_v28 = vpop.permute.xlu1 %490 }
 0x57b   :  { %3235 = vmatprep.subr.bf16.mxu0 %v3702_v1  ;;  %v496_v31 = vsel %vm217_vm3, %v491_v28, 0 }
 0x57c   :  { %v439_v32 = vpop.permute.xlu0 %438 }
 0x57e   :  { %v489_v33 = vpop.permute.xlu1 %488 }
 0x57f   :  { %v3587_v23 = vpop.eup %3586 }
 0x580   :  { %v336_v24 = vmul.f32 %v3587_v23, %v3583_v14 }
 0x581   :  { %v3589_v25 = vpop.eup %3588 }
 0x582   :  { %v338_v26 = vmul.f32 %v3589_v25, %v3585_v16  ;;  %v339_v27 = vpack.c.bf16 %v336_v24, %v336_v24 }
 0x584   :  { %3226 = vmatmul.mubr.msk.bf16.vlgmr.msra.gmra.mrb[12].mxu0 %vm217_vm3, %v339_v27  ;;  %v340_v30 = vpack.c.bf16 %v338_v26, %v338_v26 }
 0x585   :  { %3236 = vmatpush3.bf16.xpose.msra.mxu0 %v446_v29  ;;  %3237 = vmatprep.mubr.msk.bf16.mxu0 %vm3703_vm1, %v3702_v1 }
 0x586   :  { %3232 = vmatmul.mubr.msk.bf16.vlgmr.msra.gmra.mrb[4].mxu1 %vm217_vm3, %v340_v30  ;;  %3247 = vmatprep.subr.bf16.mxu0 %v3702_v1 }
 0x587   :  { %3242 = vmatpush3.bf16.xpose.msra.mxu1 %v496_v31  ;;  %3243 = vmatprep.mubr.msk.bf16.mxu1 %vm3703_vm1, %v3702_v1 }
 0x588   :  { %3253 = vmatprep.subr.bf16.mxu1 %v3702_v1 }
 0x58c   :  { %3238 = vmatmul.mubr.msk.bf16.vlgmr.msra.gmra.mrb[16].mxu0 %vm217_vm3, %v439_v32 }
 0x58d   :  { %3249 = vmatprep.mubr.msk.bf16.mxu0 %vm3703_vm1, %v3702_v1 }
 0x58e   :  { %3244 = vmatmul.mubr.msk.bf16.vlgmr.msra.gmra.mrb[8].mxu1 %vm217_vm3, %v489_v33 }
 0x58f   :  { %3255 = vmatprep.mubr.msk.bf16.mxu1 %vm3703_vm1, %v3702_v1 }
 0x657   :  { %v3929_v34 = vpop.f32.mrb[12].mxu0 }
 0x658   :  { %v3227_v35 = vpop.f32.mrb[13].mxu0 }
 0x659   :  { %v387_v36 = vpop.f32.mrb[14].mxu0  ;;  %v3931_v37 = vpop.f32.mrb[4].mxu1 }
 0x65a   :  { %v3228_v38 = vpop.f32.mrb[15].mxu0  ;;  %v3233_v39 = vpop.f32.mrb[5].mxu1 }
 0x65b   :  { %v435_v40 = vpop.f32.mrb[6].mxu1 }
 0x65c   :  { %v3234_v41 = vpop.f32.mrb[7].mxu1 }
 0x65f   :  { %v482_v42 = vpop.f32.mrb[16].mxu0 }
 0x660   :  { %v538_v44 = vmul.f32 0.35355338, %v482_v42  ;;  %v3239_v45 = vpop.f32.mrb[17].mxu0 }
 0x661   :  { %v485_v47 = vpop.f32.mrb[18].mxu0  ;;  %v532_v48 = vpop.f32.mrb[8].mxu1 }
 0x662   :  { %v539_v49 = vmul.f32 0.35355338, %v532_v48  ;;  %v3240_v50 = vpop.f32.mrb[19].mxu0  ;;  %v3245_v51 = vpop.f32.mrb[9].mxu1  ;;  %v540_v53 = vadd.f32 %v538_v44, %v3884_v52 }
 0x663   :  { %v535_v54 = vpop.f32.mrb[10].mxu1 }
 0x664   :  { %v3246_v55 = vpop.f32.mrb[11].mxu1  ;;  %v542_v56 = vsel %vm217_vm3, %v540_v53, -inf  ;;  %v541_v58 = vadd.f32 %v539_v49, %v3889_v57 }
 0x665   :  { %543 = vmax.xlane.f32.xlu0 %v542_v56 }
 0x666   :  { %v545_v59 = vsel %vm217_vm3, %v541_v58, -inf }
 0x667   :  { %546 = vmax.xlane.f32.xlu1 %v545_v59 }
 0x678   :  { %614 = vrot.lane.b32.xlu1 %v3863_v46, %s3708_s18 }
 0x67c   :  { %664 = vrot.lane.b32.xlu1 %v3861_v43, %s3709_s19 }
 0x680   :  { %714 = vrot.lane.b32.xlu1 %v3863_v46, %s3709_s19 }
 0x684   :  { %712 = vrot.lane.b32.xlu1 %v3863_v46, %s3710_s4 }
 0x6f2   :  { %v544_v60 = vpop.xlane.xlu0 %543 }
 0x6f3   :  { %v548_v61 = vsub.f32 %v540_v53, %v544_v60 }
 0x6f4   :  { %v547_v62 = vpop.xlane.xlu1 %546 }
 0x6f5   :  { %v550_v63 = vmul.f32 1.442695, %v548_v61  ;;  %v549_v0 = vsub.f32 %v541_v58, %v547_v62 }
 0x6f7   :  { %3590 = vpow2.f32 %v550_v63  ;;  %v552_v2 = vmul.f32 1.442695, %v549_v0 }
 0x6f8   :  { %v615_v3 = vpop.permute.xlu1 %614 }
 0x6f9   :  { %3592 = vpow2.f32 %v552_v2  ;;  %v620_v4 = vsel %vm346_vm4, %v615_v3, 0 }
 0x6fa   :  { %3254 = vmatpush3.bf16.msra.mxu1 %v620_v4 }
 0x6fb   :  { %3265 = vmatprep.subr.bf16.mxu1 %v3702_v1 }
 0x6fc   :  { %v665_v16 = vpop.permute.xlu1 %664 }
 0x6fd   :  { %v670_v22 = vsel %vm217_vm3, %v665_v16, 0 }
 0x700   :  { %v715_v21 = vpop.permute.xlu1 %714 }
 0x701   :  { %v3591_v5 = vpop.eup %3590  ;;  %v720_v24 = vsel %vm217_vm3, %v715_v21, 0 }
 0x702   :  { %v554_v6 = vsel %vm217_vm3, %v3591_v5, 0.0 }
 0x703   :  { %v3593_v7 = vpop.eup %3592  ;;  %555 = vadd.xlane.f32.xlu0 %v554_v6 }
 0x704   :  { %v557_v9 = vsel %vm217_vm3, %v3593_v7, 0.0  ;;  %v713_v26 = vpop.permute.xlu1 %712 }
 0x707   :  { %558 = vadd.xlane.f32.xlu0 %v557_v9 }
 0x71d   :  { %566 = vrot.lane.b32.xlu0 %v3861_v43, %s3708_s18 }
 0x721   :  { %662 = vrot.lane.b32.xlu0 %v3861_v43, %s3710_s4 }
 0x790   :  { %v556_v10 = vpop.xlane.xlu0 %555 }
 0x791   :  { %3594 = vrcp.f32 %v556_v10 }
 0x794   :  { %v559_v12 = vpop.xlane.xlu0 %558 }
 0x795   :  { %3596 = vrcp.f32 %v559_v12 }
 0x798   :  { %v567_v13 = vpop.permute.xlu0 %566 }
 0x799   :  { %v572_v14 = vsel %vm346_vm4, %v567_v13, 0 }
 0x79a   :  { %3248 = vmatpush3.bf16.msra.mxu0 %v572_v14 }
 0x79b   :  { %v3595_v15 = vpop.eup %3594  ;;  %3259 = vmatprep.subr.bf16.mxu0 %v3702_v1 }
 0x79c   :  { %v561_v17 = vmul.f32 %v3595_v15, %v3591_v5  ;;  %v663_v25 = vpop.permute.xlu0 %662 }
 0x79e   :  { %v564_v18 = vpack.c.bf16 %v561_v17, %v561_v17 }
 0x79f   :  { %v3597_v19 = vpop.eup %3596 }
 0x7a0   :  { %v563_v20 = vmul.f32 %v3597_v19, %v3593_v7  ;;  %3250 = vmatmul.mubr.msk.bf16.vlgmr.msra.gmra.mrb[20].mxu0 %vm217_vm3, %v564_v18 }
 0x7a1   :  { %3261 = vmatprep.mubr.msk.bf16.mxu0 %vm3703_vm1, %v3702_v1 }
 0x7a2   :  { %v565_v23 = vpack.c.bf16 %v563_v20, %v563_v20 }
 0x7a3   :  { %3260 = vmatpush3.bf16.xpose.msra.mxu0 %v670_v22 }
 0x7a4   :  { %3256 = vmatmul.mubr.msk.bf16.vlgmr.msra.gmra.mrb[12].mxu1 %vm217_vm3, %v565_v23  ;;  %3271 = vmatprep.subr.bf16.mxu0 %v3702_v1 }
 0x7a5   :  { %3266 = vmatpush3.bf16.xpose.msra.mxu1 %v720_v24  ;;  %3267 = vmatprep.mubr.msk.bf16.mxu1 %vm3703_vm1, %v3702_v1 }
 0x7a6   :  { %3277 = vmatprep.subr.bf16.mxu1 %v3702_v1 }
 0x7aa   :  { %3262 = vmatmul.mubr.msk.bf16.vlgmr.msra.gmra.mrb[24].mxu0 %vm217_vm3, %v663_v25 }
 0x7ab   :  { %3273 = vmatprep.mubr.msk.bf16.mxu0 %vm3703_vm1, %v3702_v1 }
 0x7ac   :  { %3268 = vmatmul.mubr.msk.bf16.vlgmr.msra.gmra.mrb[16].mxu1 %vm217_vm3, %v713_v26 }
 0x7ad   :  { %3279 = vmatprep.mubr.msk.bf16.mxu1 %vm3703_vm1, %v3702_v1 }
 0x873   :  { %v3971_v27 = vpop.f32.mrb[20].mxu0 }
 0x874   :  { %v3251_v28 = vpop.f32.mrb[21].mxu0 }
 0x875   :  { %v611_v29 = vpop.f32.mrb[22].mxu0 }
 0x876   :  { %v3252_v30 = vpop.f32.mrb[23].mxu0 }
 0x877   :  { %v3973_v31 = vpop.f32.mrb[12].mxu1 }
 0x878   :  { %v3517_v32 = vpack.i.bf16 %v3973_v31, %v3971_v27  ;;  %v3257_v33 = vpop.f32.mrb[13].mxu1 }
 0x879   :  { %v659_v35 = vpop.f32.mrb[14].mxu1 }
 0x87a   :  { %v3258_v36 = vpop.f32.mrb[15].mxu1 }
 0x87d   :  { %v706_v38 = vpop.f32.mrb[24].mxu0 }
 0x87e   :  { %v762_v39 = vmul.f32 0.35355338, %v706_v38  ;;  %v3263_v40 = vpop.f32.mrb[25].mxu0 }
 0x87f   :  { %v709_v41 = vpop.f32.mrb[26].mxu0  ;;  %v756_v42 = vpop.f32.mrb[16].mxu1 }
 0x880   :  { %v763_v44 = vmul.f32 0.35355338, %v756_v42  ;;  %v3264_v45 = vpop.f32.mrb[27].mxu0  ;;  %v3269_v47 = vpop.f32.mrb[17].mxu1  ;;  %v764_v48 = vadd.f32 %v762_v39, %v3884_v52 }
 0x881   :  { %v759_v49 = vpop.f32.mrb[18].mxu1 }
 0x882   :  { %v3270_v50 = vpop.f32.mrb[19].mxu1  ;;  %v766_v51 = vsel %vm217_vm3, %v764_v48, -inf  ;;  %v765_v53 = vadd.f32 %v763_v44, %v3889_v57 }
 0x883   :  { %767 = vmax.xlane.f32.xlu0 %v766_v51 }
 0x884   :  { %v769_v54 = vsel %vm217_vm3, %v765_v53, -inf }
 0x885   :  { %770 = vmax.xlane.f32.xlu1 %v769_v54 }
 0x896   :  { %838 = vrot.lane.b32.xlu1 %v3863_v46, %s3711_s1 }
 0x89a   :  { %888 = vrot.lane.b32.xlu1 %v3861_v43, %s4514_s20 }
 0x89e   :  { %938 = vrot.lane.b32.xlu1 %v3863_v46, %s4514_s20 }
 0x8a2   :  { %936 = vrot.lane.b32.xlu1 %v3863_v46, %s4512_s21 }
 0x910   :  { %v768_v55 = vpop.xlane.xlu0 %767 }
 0x911   :  { %v772_v56 = vsub.f32 %v764_v48, %v768_v55 }
 0x912   :  { %v771_v58 = vpop.xlane.xlu1 %770 }
 0x913   :  { %v774_v59 = vmul.f32 1.442695, %v772_v56  ;;  %v773_v60 = vsub.f32 %v765_v53, %v771_v58 }
 0x915   :  { %3598 = vpow2.f32 %v774_v59  ;;  %v776_v61 = vmul.f32 1.442695, %v773_v60 }
 0x916   :  { %v839_v62 = vpop.permute.xlu1 %838 }
 0x917   :  { %3600 = vpow2.f32 %v776_v61  ;;  %v844_v63 = vsel %vm346_vm4, %v839_v62, 0 }
 0x918   :  { %3278 = vmatpush3.bf16.msra.mxu1 %v844_v63 }
 0x919   :  { %3289 = vmatprep.subr.bf16.mxu1 %v3702_v1 }
 0x91a   :  { %v889_v12 = vpop.permute.xlu1 %888 }
 0x91b   :  { %v894_v18 = vsel %vm217_vm3, %v889_v12, 0 }
 0x91e   :  { %v939_v17 = vpop.permute.xlu1 %938 }
 0x91f   :  { %v3599_v0 = vpop.eup %3598  ;;  %v944_v20 = vsel %vm217_vm3, %v939_v17, 0 }
 0x920   :  { %v778_v2 = vsel %vm217_vm3, %v3599_v0, 0.0 }
 0x921   :  { %v3601_v3 = vpop.eup %3600  ;;  %779 = vadd.xlane.f32.xlu0 %v778_v2 }
 0x922   :  { %v781_v4 = vsel %vm217_vm3, %v3601_v3, 0.0  ;;  %v937_v22 = vpop.permute.xlu1 %936 }
 0x925   :  { %782 = vadd.xlane.f32.xlu0 %v781_v4 }
 0x93b   :  { %790 = vrot.lane.b32.xlu0 %v3861_v43, %s3711_s1 }
 0x93f   :  { %886 = vrot.lane.b32.xlu0 %v3861_v43, %s4512_s21 }
 0x9ae   :  { %v780_v5 = vpop.xlane.xlu0 %779 }
 0x9af   :  { %3602 = vrcp.f32 %v780_v5 }
 0x9b2   :  { %v783_v6 = vpop.xlane.xlu0 %782 }
 0x9b3   :  { %3604 = vrcp.f32 %v783_v6 }
 0x9b6   :  { %v791_v7 = vpop.permute.xlu0 %790 }
 0x9b7   :  { %v796_v9 = vsel %vm346_vm4, %v791_v7, 0  ;;  %v3550_v7 = vld [vmem:[%s4494_s7] sm:$0xff]  }
 0x9b8   :  { %3272 = vmatpush3.bf16.msra.mxu0 %v796_v9  ;;  %v3551_v9 = vld [vmem:[%s4494_s7 + $0x8] sm:$0xff]  }
 0x9b9   :  { %v3603_v10 = vpop.eup %3602  ;;  %3283 = vmatprep.subr.bf16.mxu0 %v3702_v1 }
 0x9ba   :  { %v785_v13 = vmul.f32 %v3603_v10, %v3599_v0  ;;  %v887_v21 = vpop.permute.xlu0 %886 }
 0x9bc   :  { %v788_v14 = vpack.c.bf16 %v785_v13, %v785_v13 }
 0x9bd   :  { %v3605_v15 = vpop.eup %3604 }
 0x9be   :  { %v787_v16 = vmul.f32 %v3605_v15, %v3601_v3  ;;  %3274 = vmatmul.mubr.msk.bf16.vlgmr.msra.gmra.mrb[28].mxu0 %vm217_vm3, %v788_v14 }
 0x9bf   :  { %3285 = vmatprep.mubr.msk.bf16.mxu0 %vm3703_vm1, %v3702_v1 }
 0x9c0   :  { %v789_v19 = vpack.c.bf16 %v787_v16, %v787_v16 }
 0x9c1   :  { %3284 = vmatpush3.bf16.xpose.msra.mxu0 %v894_v18 }
 0x9c2   :  { %3280 = vmatmul.mubr.msk.bf16.vlgmr.msra.gmra.mrb[20].mxu1 %vm217_vm3, %v789_v19  ;;  %3295 = vmatprep.subr.bf16.mxu0 %v3702_v1 }
 0x9c3   :  { %3290 = vmatpush3.bf16.xpose.msra.mxu1 %v944_v20  ;;  %3291 = vmatprep.mubr.msk.bf16.mxu1 %vm3703_vm1, %v3702_v1 }
 0x9c4   :  { %3301 = vmatprep.subr.bf16.mxu1 %v3702_v1 }
 0x9c8   :  { %3286 = vmatmul.mubr.msk.bf16.vlgmr.msra.gmra.mrb[32].mxu0 %vm217_vm3, %v887_v21 }
 0x9c9   :  { %3297 = vmatprep.mubr.msk.bf16.mxu0 %vm3703_vm1, %v3702_v1 }
 0x9ca   :  { %3292 = vmatmul.mubr.msk.bf16.vlgmr.msra.gmra.mrb[24].mxu1 %vm217_vm3, %v937_v22 }
 0x9cb   :  { %3303 = vmatprep.mubr.msk.bf16.mxu1 %vm3703_vm1, %v3702_v1 }
 0xa91   :  { %v832_v23 = vpop.f32.mrb[28].mxu0 }
 0xa92   :  { %v3275_v24 = vpop.f32.mrb[29].mxu0 }
 0xa93   :  { %v835_v25 = vpop.f32.mrb[30].mxu0 }
 0xa94   :  { %v3276_v26 = vpop.f32.mrb[31].mxu0 }
 0xa95   :  { %v880_v28 = vpop.f32.mrb[20].mxu1 }
 0xa96   :  { %v3522_v29 = vpack.i.bf16 %v880_v28, %v832_v23  ;;  %v3281_v30 = vpop.f32.mrb[21].mxu1 }
 0xa97   :  { %v883_v33 = vpop.f32.mrb[22].mxu1 }
 0xa98   :  { %v3282_v35 = vpop.f32.mrb[23].mxu1 }
 0xa9b   :  { %v930_v36 = vpop.f32.mrb[32].mxu0 }
 0xa9c   :  { %v986_v38 = vmul.f32 0.35355338, %v930_v36  ;;  %v3287_v39 = vpop.f32.mrb[33].mxu0 }
 0xa9d   :  { %v933_v40 = vpop.f32.mrb[34].mxu0  ;;  %v980_v41 = vpop.f32.mrb[24].mxu1 }
 0xa9e   :  { %v987_v42 = vmul.f32 0.35355338, %v980_v41  ;;  %v3288_v44 = vpop.f32.mrb[35].mxu0  ;;  %v3293_v45 = vpop.f32.mrb[25].mxu1  ;;  %v988_v47 = vadd.f32 %v986_v38, %v3884_v52 }
 0xa9f   :  { %v983_v48 = vpop.f32.mrb[26].mxu1 }
 0xaa0   :  { %v3294_v49 = vpop.f32.mrb[27].mxu1  ;;  %v990_v50 = vsel %vm217_vm3, %v988_v47, -inf  ;;  %v989_v51 = vadd.f32 %v987_v42, %v3889_v57 }
 0xaa1   :  { %991 = vmax.xlane.f32.xlu0 %v990_v50 }
 0xaa2   :  { %v993_v53 = vsel %vm217_vm3, %v989_v51, -inf }
 0xaa3   :  { %994 = vmax.xlane.f32.xlu1 %v993_v53 }
 0xab4   :  { %1062 = vrot.lane.b32.xlu1 %v3863_v46, %s4510_s22 }
 0xab8   :  { %3518 = vrot.lane.b32.xlu1 %v3517_v32, %s4509_s23 }
 0xabc   :  { %3523 = vrot.lane.b32.xlu1 %v3522_v29, %s4507_s25 }
 0xb2e   :  { %v992_v52 = vpop.xlane.xlu0 %991 }
 0xb2f   :  { %v996_v54 = vsub.f32 %v988_v47, %v992_v52 }
 0xb30   :  { %v995_v57 = vpop.xlane.xlu1 %994 }
 0xb31   :  { %v998_v55 = vmul.f32 1.442695, %v996_v54  ;;  %v997_v56 = vsub.f32 %v989_v51, %v995_v57 }
 0xb33   :  { %3606 = vpow2.f32 %v998_v55  ;;  %v1000_v58 = vmul.f32 1.442695, %v997_v56 }
 0xb34   :  { %v1063_v59 = vpop.permute.xlu1 %1062 }
 0xb35   :  { %3608 = vpow2.f32 %v1000_v58  ;;  %v1068_v46 = vsel %vm346_vm4, %v1063_v59, 0 }
 0xb36   :  { %3302 = vmatpush3.bf16.msra.mxu1 %v1068_v46  ;;  %v3552_v46 = vld [vmem:[%s4496_s9] sm:$0xff]  }
 0xb37   :  { %3315 = vmatprep.subr.bf16.mxu1 %v3702_v1 }
 0xb38   :  { %v3519_v20 = vpop.permute.xlu1 %3518 }
 0xb39   :  { %v3521_v22 = vunpack.i.h.bf16 %v3519_v20  ;;  %v3520_v23 = vunpack.i.l.bf16 %v3519_v20 }
 0xb3b   :  { %v1135_v28 = vsel %vm217_vm3, %v3931_v37, %v3521_v22  ;;  %v1134_v29 = vsel %vm217_vm3, %v3929_v34, %v3520_v23  ;;  %v3000_v34 = vld [vmem:[%s4495_s8] ss:$0 sm:$0xff] }
 0xb3c   :  { %v3524_v21 = vpop.permute.xlu1 %3523 }
 0xb3d   :  { %v3607_v60 = vpop.eup %3606  ;;  %v3526_v24 = vunpack.i.h.bf16 %v3524_v21  ;;  %v3525_v25 = vunpack.i.l.bf16 %v3524_v21 }
 0xb3e   :  { %v1002_v27 = vsel %vm217_vm3, %v3607_v60, 0.0 }
 0xb3f   :  { %v3609_v31 = vpop.eup %3608  ;;  %1003 = vadd.xlane.f32.xlu0 %v1002_v27  ;;  %v1137_v35 = vsel %vm69_vm0, %v1135_v28, %v3526_v24  ;;  %v1136_v36 = vsel %vm69_vm0, %v1134_v29, %v3525_v25 }
 0xb40   :  { %v1005_v32 = vsel %vm217_vm3, %v3609_v31, 0.0 }
 0xb43   :  { %1006 = vadd.xlane.f32.xlu0 %v1005_v32 }
 0xb59   :  { %1014 = vrot.lane.b32.xlu0 %v3861_v43, %s4510_s22  ;;  %s4525_s22 = smov 24  }
 0xbcc   :  { %v1004_v61 = vpop.xlane.xlu0 %1003 }
 0xbcd   :  { %3610 = vrcp.f32 %v1004_v61 }
 0xbd0   :  { %v1007_v62 = vpop.xlane.xlu0 %1006 }
 0xbd1   :  { %3612 = vrcp.f32 %v1007_v62 }
 0xbd4   :  { %v1015_v63 = vpop.permute.xlu0 %1014 }
 0xbd5   :  { %v1020_v0 = vsel %vm346_vm4, %v1015_v63, 0 }
 0xbd6   :  { %3296 = vmatpush3.bf16.msra.mxu0 %v1020_v0 }
 0xbd7   :  { %v3611_v2 = vpop.eup %3610  ;;  %3307 = vmatprep.subr.bf16.mxu0 %v3702_v1 }
 0xbd8   :  { %v1009_v3 = vmul.f32 %v3611_v2, %v3607_v60  ;;  %v3553_v60 = vld [vmem:[%s4496_s9 + $0x8] sm:$0xff]  }
 0xbda   :  { %v1012_v4 = vpack.c.bf16 %v1009_v3, %v1009_v3 }
 0xbdb   :  { %v3613_v5 = vpop.eup %3612 }
 0xbdc   :  { %v1011_v6 = vmul.f32 %v3613_v5, %v3609_v31  ;;  %3298 = vmatmul.mubr.msk.bf16.vlgmr.msra.gmra.mrb[36].mxu0 %vm217_vm3, %v1012_v4 }
 0xbdd   :  { %3311 = vmatprep.mubr.msk.bf16.mxu0 %vm3703_vm1, %v3702_v1  ;;  %3308 = vmatpush3.bf16.msra.mxu0 %v3550_v7  ;;  %v3556_v7 = vld [vmem:[%s4498_s11 + $0x10] sm:$0xff]  }
 0xbde   :  { %v1013_v43 = vpack.c.bf16 %v1011_v6, %v1011_v6  ;;  %3309 = vmatprep.subr.bf16.mxu0 %v3702_v1  ;;  %v3554_v6 = vld [vmem:[%s4498_s11] sm:$0xff]  }
 0xbe0   :  { %3304 = vmatmul.mubr.msk.bf16.vlgmr.msra.gmra.mrb[28].mxu1 %vm217_vm3, %v1013_v43  ;;  %v3555_v43 = vld [vmem:[%s4498_s11 + $0x8] sm:$0xff]  }
 0xbe1   :  { %3319 = vmatprep.mubr.msk.bf16.mxu1 %vm3703_vm1, %v3702_v1  ;;  %3310 = vmatpush3.bf16.msra.mxu0 %v3551_v9  ;;  %v3557_v9 = vld [vmem:[%s4498_s11 + $0x18] sm:$0xff]  }
 0xbe2   :  { %3323 = vmatprep.subr.bf16.mxu0 %v3702_v1  ;;  %3316 = vmatpush3.bf16.msra.mxu1 %v3552_v46 }
 0xbe3   :  { %3317 = vmatprep.subr.bf16.mxu1 %v3702_v1 }
 0xbe6   :  { %3318 = vmatpush3.bf16.msra.mxu1 %v3553_v60 }
 0xbe7   :  { %3343 = vmatprep.subr.bf16.mxu1 %v3702_v1 }
 0xcaf   :  { %v1056_v10 = vpop.f32.mrb[36].mxu0 }
 0xcb0   :  { %v3299_v12 = vpop.f32.mrb[37].mxu0 }
 0xcb1   :  { %v1059_v13 = vpop.f32.mrb[38].mxu0  ;;  %v3559_v12 = vld [vmem:[%s4498_s11 + $0x28] sm:$0xff]  }
 0xcb2   :  { %v3300_v14 = vpop.f32.mrb[39].mxu0  ;;  %v3560_v13 = vld [vmem:[%s4498_s11 + $0x30] sm:$0xff]  }
 0xcb3   :  { %v1104_v15 = vpop.f32.mrb[28].mxu1  ;;  %v3561_v14 = vld [vmem:[%s4498_s11 + $0x38] sm:$0xff]  }
 0xcb4   :  { %v3527_v16 = vpack.i.bf16 %v1104_v15, %v1056_v10  ;;  %v3305_v17 = vpop.f32.mrb[29].mxu1  ;;  %v3558_v10 = vld [vmem:[%s4498_s11 + $0x20] sm:$0xff]  }
 0xcb5   :  { %v1107_v18 = vpop.f32.mrb[30].mxu1  ;;  %v3004_v15 = vld [vmem:[%s4497_s10] ss:$0 sm:$0xff] }
 0xcb6   :  { %v3306_v19 = vpop.f32.mrb[31].mxu1  ;;  %3528 = vrot.lane.b32.xlu0 %v3527_v16, %s4508_s26 }
 0xd28   :  { %v3529_v26 = vpop.permute.xlu0 %3528 }
 0xd29   :  { %v3531_v30 = vunpack.i.h.bf16 %v3529_v26  ;;  %v3530_v33 = vunpack.i.l.bf16 %v3529_v26 }
 0xd2b   :  { %v1140_v38 = vsel %vm1138_vm5, %v1137_v35, %v3531_v30  ;;  %v1139_v39 = vsel %vm1138_vm5, %v1136_v36, %v3530_v33 }
 0xd2c   :  { %v1141_v40 = vpack.c.bf16 %v1140_v38, %v1139_v39 }
 0xd2e   :  { %3312 = vmatmul.mubr.msk.bf16.vlgmr.msra.gmra.mrb[40].mxu0 %vm116_vm2, %v1141_v40 }
 0xd2f   :  { %3339 = vmatprep.mubr.msk.bf16.mxu0 %vm3703_vm1, %v3702_v1  ;;  %3324 = vmatpush3.bf16.msra.mxu0 %v3554_v6 }
 0xd30   :  { %3325 = vmatprep.subr.bf16.mxu0 %v3702_v1 }
 0xd33   :  { %3326 = vmatpush3.bf16.msra.mxu0 %v3555_v43 }
 0xd34   :  { %3327 = vmatprep.subr.bf16.mxu0 %v3702_v1 }
 0xd37   :  { %3328 = vmatpush3.bf16.msra.mxu0 %v3556_v7 }
 0xd38   :  { %3329 = vmatprep.subr.bf16.mxu0 %v3702_v1 }
 0xd3b   :  { %3330 = vmatpush3.bf16.msra.mxu0 %v3557_v9 }
 0xd3c   :  { %3331 = vmatprep.subr.bf16.mxu0 %v3702_v1 }
 0xd3f   :  { %3332 = vmatpush3.bf16.msra.mxu0 %v3558_v10 }
 0xd40   :  { %3333 = vmatprep.subr.bf16.mxu0 %v3702_v1 }
 0xd43   :  { %3334 = vmatpush3.bf16.msra.mxu0 %v3559_v12  ;;  %v3022_v12 = vld [vmem:[%s4493_s6 + $0x1] ss:$0 sm:$0xff] }
 0xd44   :  { %3335 = vmatprep.subr.bf16.mxu0 %v3702_v1 }
 0xd47   :  { %3336 = vmatpush3.bf16.msra.mxu0 %v3560_v13 }
 0xd48   :  { %3337 = vmatprep.subr.bf16.mxu0 %v3702_v1 }
 0xd4b   :  { %3338 = vmatpush3.bf16.msra.mxu0 %v3561_v14 }
 0xd4c   :  { %3369 = vmatprep.subr.bf16.mxu0 %v3702_v1 }
 0xe01   :  { %v1202_v37 = vpop.f32.mrb[40].mxu0 }
 0xe02   :  { %v1203_v41 = vadd.f32 %v3000_v34, %v1202_v37  ;;  %v3313_v42 = vpop.f32.mrb[41].mxu0 }
 0xe03   :  { %v1205_v44 = vpop.f32.mrb[42].mxu0 }
 0xe04   :  { %v4064_v45 = vadd.f32 %v1203_v41, %v3835_v8  ;;  %v1206_v47 = vadd.f32 %v3000_v34, %v1205_v44  ;;  %v3314_v48 = vpop.f32.mrb[43].mxu0 }
 0xe06   :  { %v4067_v49 = vadd.f32 %v1206_v47, %v3837_v11  ;;  %v1211_v50 = vsel %vm116_vm2, %v4064_v45, 0.0  ;;  %v3008_v47 = vld [vmem:[%s4499_s12] ss:$0 sm:$0xff] }
 0xe07   :  { %1212 = vadd.xlane.f32.xlu1 %v1211_v50 }
 0xe08   :  { %v1214_v51 = vsel %vm116_vm2, %v4067_v49, 0.0 }
 0xe09   :  { %1215 = vadd.xlane.f32.xlu0 %v1214_v51 }
 0xe94   :  { %v1213_v53 = vpop.xlane.xlu1 %1212 }
 0xe95   :  { %v1217_v52 = vmul.f32 0.03125, %v1213_v53 }
 0xe96   :  { %v1216_v54 = vpop.xlane.xlu0 %1215 }
 0xe97   :  { %v1219_v57 = vsub.f32 %v4064_v45, %v1217_v52  ;;  %v1218_v8 = vmul.f32 0.03125, %v1216_v54 }
 0xe99   :  { %v1220_v55 = vsub.f32 %v4067_v49, %v1218_v8  ;;  %v1221_v56 = vmul.f32 %v1219_v57, %v1219_v57 }
 0xe9b   :  { %v1223_v11 = vsel %vm116_vm2, %v1221_v56, 0.0  ;;  %v1222_v58 = vmul.f32 %v1220_v55, %v1220_v55 }
 0xe9c   :  { %1224 = vadd.xlane.f32.xlu0 %v1223_v11 }
 0xe9d   :  { %v1226_v59 = vsel %vm116_vm2, %v1222_v58, 0.0 }
 0xea0   :  { %1227 = vadd.xlane.f32.xlu0 %v1226_v59 }
 0xf29   :  { %v1225_v27 = vpop.xlane.xlu0 %1224 }
 0xf2a   :  { %v1229_v31 = vmul.f32 0.03125, %v1225_v27 }
 0xf2c   :  { %v1231_v32 = vadd.f32 1e-05, %v1229_v31 }
 0xf2d   :  { %v1228_v61 = vpop.xlane.xlu0 %1227 }
 0xf2e   :  { %v1230_v62 = vmul.f32 0.03125, %v1228_v61  ;;  %3614 = vrsqrt.f32 %v1231_v32  ;;  %v3562_v61 = vld [vmem:[%s4492_s5 + $0x10] sm:$0xff]  }
 0xf30   :  { %v1232_v63 = vadd.f32 1e-05, %v1230_v62  ;;  %v3563_v62 = vld [vmem:[%s4492_s5 + $0x18] sm:$0xff]  }
 0xf32   :  { %3616 = vrsqrt.f32 %v1232_v63 }
 0xf38   :  { %v3615_v0 = vpop.eup %3614 }
 0xf39   :  { %v1235_v3 = vmul.f32 %v3615_v0, %v1219_v57 }
 0xf3c   :  { %v3617_v2 = vpop.eup %3616 }
 0xf3d   :  { %v1236_v4 = vmul.f32 %v3617_v2, %v1220_v55 }
 0xf3f   :  { %v1237_v5 = vpack.c.bf16 %v1236_v4, %v1235_v3 }
 0xf41   :  { %3320 = vmatmul.mubr.msk.bf16.vlgmr.msra.gmra.mrb[32].mxu1 %vm116_vm2, %v1237_v5 }
 0xf42   :  { %3347 = vmatprep.mubr.msk.bf16.mxu1 %vm3703_vm1, %v3702_v1  ;;  %3344 = vmatpush3.bf16.msra.mxu1 %v3562_v61 }
 0xf43   :  { %3345 = vmatprep.subr.bf16.mxu1 %v3702_v1 }
 0xf46   :  { %3346 = vmatpush3.bf16.msra.mxu1 %v3563_v62 }
 0xf47   :  { %3351 = vmatprep.subr.bf16.mxu1 %v3702_v1 }
0x1014   :  { %v1298_v16 = vpop.f32.mrb[32].mxu1 }
0x1015   :  { %v1299_v17 = vadd.f32 %v3004_v15, %v1298_v16  ;;  %v3321_v18 = vpop.f32.mrb[33].mxu1 }
0x1016   :  { %v1301_v19 = vpop.f32.mrb[34].mxu1 }
0x1017   :  { %v1307_v20 = vmul.f32 0.044715, %v1299_v17  ;;  %v1302_v21 = vadd.f32 %v3004_v15, %v1301_v19  ;;  %v3322_v22 = vpop.f32.mrb[35].mxu1  ;;  %v1305_v40 = vmul.f32 0.5, %v1299_v17 }
0x1019   :  { %v1309_v23 = vmul.f32 %v1307_v20, %v1299_v17  ;;  %v1308_v24 = vmul.f32 0.044715, %v1302_v21  ;;  %v1306_v34 = vmul.f32 0.5, %v1302_v21 }
0x101b   :  { %v1311_v25 = vmul.f32 %v1309_v23, %v1299_v17  ;;  %v1310_v26 = vmul.f32 %v1308_v24, %v1302_v21 }
0x101d   :  { %v1313_v28 = vadd.f32 %v1311_v25, %v1299_v17  ;;  %v1312_v29 = vmul.f32 %v1310_v26, %v1302_v21 }
0x101f   :  { %v1315_v30 = vmul.f32 0.7978846, %v1313_v28  ;;  %v1314_v33 = vadd.f32 %v1312_v29, %v1302_v21 }
0x1021   :  { %3618 = vtanh.f32 %v1315_v30  ;;  %v1316_v35 = vmul.f32 0.7978846, %v1314_v33  ;;  %v4179_v33 = vld [vmem:[%s4519_s27] sm:$0xff] }
0x1023   :  { %3620 = vtanh.f32 %v1316_v35 }
0x102b   :  { %v3619_v36 = vpop.eup %3618 }
0x102c   :  { %v1319_v38 = vadd.f32 1.0, %v3619_v36 }
0x102d   :  { %v3621_v39 = vpop.eup %3620 }
0x102e   :  { %v1320_v37 = vadd.f32 1.0, %v3621_v39  ;;  %v1321_v41 = vmul.f32 %v1319_v38, %v1305_v40 }
0x1030   :  { %v1322_v42 = vmul.f32 %v1320_v37, %v1306_v34 }
0x1032   :  { %v1323_v44 = vpack.c.bf16 %v1322_v42, %v1321_v41  ;;  %v4186_v41 = vld [vmem:[%s4519_s27 + $0x8] sm:$0xff]  ;;  %s4520_s27 = smov 72  }
0x1034   :  { %3340 = vmatmul.mubr.bf16.vlgmr.msra.gmra.mrb[44].mxu0 %v1323_v44 }
0x1035   :  { %3371 = vmatprep.mubr.msk.bf16.mxu0 %vm3703_vm1, %v3702_v1 }
0x1107   :  { %v1429_v48 = vpop.f32.mrb[44].mxu0 }
0x1108   :  { %v1430_v50 = vadd.f32 %v3008_v47, %v1429_v48  ;;  %v3341_v51 = vpop.f32.mrb[45].mxu0 }
0x1109   :  { %v1432_v53 = vpop.f32.mrb[46].mxu0 }
0x110a   :  { %v4129_v52 = vadd.f32 %v1430_v50, %v4064_v45  ;;  %v1433_v54 = vadd.f32 %v3008_v47, %v1432_v53  ;;  %v3342_v57 = vpop.f32.mrb[47].mxu0 }
0x110c   :  { %v4132_v8 = vadd.f32 %v1433_v54, %v4067_v49  ;;  %v1438_v55 = vsel %vm116_vm2, %v4129_v52, 0.0 }
0x110d   :  { %1439 = vadd.xlane.f32.xlu1 %v1438_v55 }
0x110e   :  { %v1441_v56 = vsel %vm116_vm2, %v4132_v8, 0.0 }
0x110f   :  { %1442 = vadd.xlane.f32.xlu0 %v1441_v56 }
0x119a   :  { %v1440_v11 = vpop.xlane.xlu1 %1439 }
0x119b   :  { %v1444_v58 = vmul.f32 0.03125, %v1440_v11 }
0x119c   :  { %v1443_v59 = vpop.xlane.xlu0 %1442 }
0x119d   :  { %v1446_v46 = vsub.f32 %v4129_v52, %v1444_v58  ;;  %v1445_v45 = vmul.f32 0.03125, %v1443_v59 }
0x119f   :  { %v1447_v60 = vsub.f32 %v4132_v8, %v1445_v45  ;;  %v1448_v27 = vmul.f32 %v1446_v46, %v1446_v46 }
0x11a1   :  { %v1450_v49 = vsel %vm116_vm2, %v1448_v27, 0.0  ;;  %v1449_v31 = vmul.f32 %v1447_v60, %v1447_v60 }
0x11a2   :  { %1451 = vadd.xlane.f32.xlu1 %v1450_v49 }
0x11a3   :  { %v1453_v32 = vsel %vm116_vm2, %v1449_v31, 0.0 }
0x11a4   :  { %1454 = vadd.xlane.f32.xlu0 %v1453_v32 }
0x122f   :  { %v1452_v63 = vpop.xlane.xlu1 %1451 }
0x1230   :  { %v1456_v0 = vmul.f32 0.03125, %v1452_v63 }
0x1231   :  { %v1455_v2 = vpop.xlane.xlu0 %1454 }
0x1232   :  { %v1458_v3 = vadd.f32 1e-05, %v1456_v0  ;;  %v1457_v4 = vmul.f32 0.03125, %v1455_v2 }
0x1234   :  { %3622 = vrsqrt.f32 %v1458_v3  ;;  %v1459_v5 = vadd.f32 1e-05, %v1457_v4 }
0x1236   :  { %3624 = vrsqrt.f32 %v1459_v5 }
0x123e   :  { %v3623_v6 = vpop.eup %3622 }
0x123f   :  { %v1462_v7 = vmul.f32 %v3623_v6, %v1446_v46 }
0x1240   :  { %v3625_v43 = vpop.eup %3624 }
0x1241   :  { %v1463_v9 = vmul.f32 %v3625_v43, %v1447_v60 }
0x1243   :  { %v1464_v10 = vpack.c.bf16 %v1463_v9, %v1462_v7 }
0x1245   :  { %3348 = vmatmul.mubr.msk.bf16.vlgmr.msra.gmra.mrb[36].mxu1 %vm116_vm2, %v1464_v10 }
0x1246   :  { %3353 = vmatprep.mubr.msk.bf16.mxu1 %vm3703_vm1, %v3702_v1 }
0x1318   :  { %v1527_v13 = vpop.f32.mrb[36].mxu1 }
0x1319   :  { %v1528_v14 = vadd.f32 %v3022_v12, %v1527_v13  ;;  %v3349_v15 = vpop.f32.mrb[37].mxu1 }
0x131a   :  { %v1530_v16 = vpop.f32.mrb[38].mxu1 }
0x131b   :  { %v4156_v17 = vpack.c.bf16 %v1528_v14, %v1528_v14  ;;  %v1531_v18 = vadd.f32 %v3022_v12, %v1530_v16  ;;  %v3350_v19 = vpop.f32.mrb[39].mxu1 }
0x131d   :  { %v4158_v20 = vpack.c.bf16 %v1531_v18, %v1531_v18  ;;  %1537 = vrot.lane.b32.xlu1 %v4156_v17, %s3704_s24 }
0x131f   :  { %1586 = vrot.lane.b32.xlu0 %v4158_v20, %s3704_s24 }
0x138f   :  { %v1538_v21 = vpop.permute.xlu1 %1537 }
0x1390   :  { %v1543_v22 = vsel %vm217_vm3, %v1538_v21, 0 }
0x1391   :  { %3352 = vmatpush3.bf16.xpose.msra.mxu1 %v1543_v22  ;;  %v1587_v23 = vpop.permute.xlu0 %1586 }
0x1392   :  { %3357 = vmatprep.subr.bf16.mxu1 %v3702_v1  ;;  %v1592_v24 = vsel %vm217_vm3, %v1587_v23, 0 }
0x1398   :  { %3354 = vmatmul.mubr.msk.bf16.vlgmr.msra.gmra.mrb[40].mxu1 %vm217_vm3, %v4156_v17 }
0x1399   :  { %3358 = vmatpush3.bf16.xpose.msra.mxu1 %v1592_v24  ;;  %3359 = vmatprep.mubr.msk.bf16.mxu1 %vm3703_vm1, %v3702_v1 }
0x139a   :  { %3363 = vmatprep.subr.bf16.mxu1 %v3702_v1 }
0x13a0   :  { %3360 = vmatmul.mubr.msk.bf16.vlgmr.msra.gmra.mrb[44].mxu1 %vm217_vm3, %v4158_v20 }
0x13a1   :  { %3365 = vmatprep.mubr.msk.bf16.mxu1 %vm3703_vm1, %v3702_v1 }
0x146b   :  { %v1579_v25 = vpop.f32.mrb[40].mxu1 }
0x146c   :  { %v1634_v26 = vmul.f32 0.35355338, %v1579_v25  ;;  %v3355_v28 = vpop.f32.mrb[41].mxu1 }
0x146d   :  { %v1582_v29 = vpop.f32.mrb[42].mxu1 }
0x146e   :  { %v3356_v30 = vpop.f32.mrb[43].mxu1  ;;  %v1636_v35 = vadd.f32 %v4179_v33, %v1634_v26 }
0x1470   :  { %v1638_v36 = vsel %vm217_vm3, %v1636_v35, -inf }
0x1471   :  { %1639 = vmax.xlane.f32.xlu1 %v1638_v36 }
0x1473   :  { %v1628_v38 = vpop.f32.mrb[44].mxu1 }
0x1474   :  { %v1635_v39 = vmul.f32 0.35355338, %v1628_v38  ;;  %v3361_v40 = vpop.f32.mrb[45].mxu1 }
0x1475   :  { %v1631_v34 = vpop.f32.mrb[46].mxu1 }
0x1476   :  { %v3362_v37 = vpop.f32.mrb[47].mxu1  ;;  %v1637_v42 = vadd.f32 %v4186_v41, %v1635_v39 }
0x1478   :  { %v1641_v44 = vsel %vm217_vm3, %v1637_v42, -inf }
0x1479   :  { %1642 = vmax.xlane.f32.xlu0 %v1641_v44 }
0x1482   :  { %1662 = vrot.lane.b32.xlu1 %v4156_v17, %s3705_s0 }
0x14fe   :  { %v1640_v47 = vpop.xlane.xlu1 %1639 }
0x14ff   :  { %v1644_v48 = vsub.f32 %v1636_v35, %v1640_v47 }
0x1501   :  { %v1646_v50 = vmul.f32 1.442695, %v1644_v48 }
0x1502   :  { %v1663_v51 = vpop.permute.xlu1 %1662 }
0x1503   :  { %3626 = vpow2.f32 %v1646_v50  ;;  %v1668_v53 = vsel %vm346_vm4, %v1663_v51, 0 }
0x1504   :  { %3364 = vmatpush3.bf16.msra.mxu1 %v1668_v53 }
0x1505   :  { %3375 = vmatprep.subr.bf16.mxu1 %v3702_v1 }
0x1506   :  { %v1643_v54 = vpop.xlane.xlu0 %1642 }
0x1507   :  { %v1645_v57 = vsub.f32 %v1637_v42, %v1643_v54 }
0x1509   :  { %v1648_v55 = vmul.f32 1.442695, %v1645_v57 }
0x150b   :  { %3628 = vpow2.f32 %v1648_v55 }
0x150d   :  { %v3627_v56 = vpop.eup %3626 }
0x150e   :  { %v1650_v11 = vsel %vm217_vm3, %v3627_v56, 0.0 }
0x150f   :  { %1651 = vadd.xlane.f32.xlu1 %v1650_v11 }
0x1515   :  { %v3629_v58 = vpop.eup %3628 }
0x1516   :  { %v1653_v59 = vsel %vm217_vm3, %v3629_v58, 0.0 }
0x1517   :  { %1654 = vadd.xlane.f32.xlu0 %v1653_v59 }
0x1520   :  { %1760 = vrot.lane.b32.xlu1 %v4156_v17, %s3706_s3 }
0x1524   :  { %1810 = vrot.lane.b32.xlu1 %v4158_v20, %s3706_s3  ;;  %s4522_s3 = smov 40  }
0x1528   :  { %1758 = vrot.lane.b32.xlu1 %v4156_v17, %s3707_s30 }
0x152d   :  { %1710 = vrot.lane.b32.xlu0 %v4158_v20, %s3705_s0  ;;  %s4521_s0 = smov 104  }
0x1531   :  { %1808 = vrot.lane.b32.xlu0 %v4158_v20, %s3707_s30  ;;  %s4523_s30 = smov 8  }
0x159c   :  { %v1652_v46 = vpop.xlane.xlu1 %1651 }
0x159d   :  { %3630 = vrcp.f32 %v1652_v46 }
0x15a0   :  { %v1761_v27 = vpop.permute.xlu1 %1760 }
0x15a1   :  { %v1766_v62 = vsel %vm217_vm3, %v1761_v27, 0 }
0x15a4   :  { %v1655_v45 = vpop.xlane.xlu0 %1654  ;;  %v1811_v63 = vpop.permute.xlu1 %1810 }
0x15a5   :  { %3632 = vrcp.f32 %v1655_v45  ;;  %v1816_v5 = vsel %vm217_vm3, %v1811_v63, 0 }
0x15a7   :  { %v3631_v60 = vpop.eup %3630 }
0x15a8   :  { %v1657_v49 = vmul.f32 %v3631_v60, %v3627_v56  ;;  %v1711_v31 = vpop.permute.xlu0 %1710  ;;  %v1759_v4 = vpop.permute.xlu1 %1758 }
0x15a9   :  { %v1716_v32 = vsel %vm346_vm4, %v1711_v31, 0 }
0x15aa   :  { %3370 = vmatpush3.bf16.msra.mxu0 %v1716_v32  ;;  %v1660_v61 = vpack.c.bf16 %v1657_v49, %v1657_v49 }
0x15ab   :  { %3381 = vmatprep.subr.bf16.mxu0 %v3702_v1 }
0x15ac   :  { %3366 = vmatmul.mubr.msk.bf16.vlgmr.msra.gmra.mrb[48].mxu1 %vm217_vm3, %v1660_v61  ;;  %v1809_v6 = vpop.permute.xlu0 %1808 }
0x15ad   :  { %3376 = vmatpush3.bf16.xpose.msra.mxu1 %v1766_v62  ;;  %3377 = vmatprep.mubr.msk.bf16.mxu1 %vm3703_vm1, %v3702_v1 }
0x15ae   :  { %3387 = vmatprep.subr.bf16.mxu1 %v3702_v1 }
0x15af   :  { %v3633_v0 = vpop.eup %3632 }
0x15b0   :  { %v1659_v2 = vmul.f32 %v3633_v0, %v3629_v58 }
0x15b2   :  { %v1661_v3 = vpack.c.bf16 %v1659_v2, %v1659_v2 }
0x15b4   :  { %3372 = vmatmul.mubr.msk.bf16.vlgmr.msra.gmra.mrb[48].mxu0 %vm217_vm3, %v1661_v3  ;;  %3378 = vmatmul.mubr.msk.bf16.vlgmr.msra.gmra.mrb[52].mxu1 %vm217_vm3, %v1759_v4 }
0x15b5   :  { %3382 = vmatpush3.bf16.xpose.msra.mxu0 %v1816_v5  ;;  %3383 = vmatprep.mubr.msk.bf16.mxu0 %vm3703_vm1, %v3702_v1 }
0x15b6   :  { %3393 = vmatprep.subr.bf16.mxu0 %v3702_v1  ;;  %3389 = vmatprep.mubr.msk.bf16.mxu1 %vm3703_vm1, %v3702_v1 }
0x15bc   :  { %3384 = vmatmul.mubr.msk.bf16.vlgmr.msra.gmra.mrb[52].mxu0 %vm217_vm3, %v1809_v6 }
0x15bd   :  { %3395 = vmatprep.mubr.msk.bf16.mxu0 %vm3703_vm1, %v3702_v1 }
0x167f   :  { %v4224_v43 = vpop.f32.mrb[48].mxu1 }
0x1680   :  { %v3367_v7 = vpop.f32.mrb[49].mxu1 }
0x1681   :  { %v1707_v9 = vpop.f32.mrb[50].mxu1 }
0x1682   :  { %v3368_v10 = vpop.f32.mrb[51].mxu1 }
0x1687   :  { %v4226_v12 = vpop.f32.mrb[48].mxu0  ;;  %v1802_v13 = vpop.f32.mrb[52].mxu1 }
0x1688   :  { %v1858_v14 = vmul.f32 0.35355338, %v1802_v13  ;;  %v3373_v15 = vpop.f32.mrb[49].mxu0  ;;  %v3379_v16 = vpop.f32.mrb[53].mxu1 }
0x1689   :  { %v1755_v18 = vpop.f32.mrb[50].mxu0  ;;  %v1805_v19 = vpop.f32.mrb[54].mxu1 }
0x168a   :  { %v3374_v21 = vpop.f32.mrb[51].mxu0  ;;  %v3380_v22 = vpop.f32.mrb[55].mxu1  ;;  %v1860_v23 = vadd.f32 %v4179_v33, %v1858_v14 }
0x168c   :  { %v1862_v24 = vsel %vm217_vm3, %v1860_v23, -inf }
0x168d   :  { %1863 = vmax.xlane.f32.xlu1 %v1862_v24 }
0x168f   :  { %v1852_v25 = vpop.f32.mrb[52].mxu0 }
0x1690   :  { %v1859_v26 = vmul.f32 0.35355338, %v1852_v25  ;;  %v3385_v28 = vpop.f32.mrb[53].mxu0 }
0x1691   :  { %v1855_v29 = vpop.f32.mrb[54].mxu0 }
0x1692   :  { %v3386_v30 = vpop.f32.mrb[55].mxu0  ;;  %v1861_v35 = vadd.f32 %v4186_v41, %v1859_v26 }
0x1694   :  { %v1865_v36 = vsel %vm217_vm3, %v1861_v35, -inf }
0x1695   :  { %1866 = vmax.xlane.f32.xlu0 %v1865_v36 }
0x169e   :  { %1886 = vrot.lane.b32.xlu1 %v4156_v17, %s3708_s18 }
0x16a2   :  { %1984 = vrot.lane.b32.xlu1 %v4156_v17, %s3709_s19 }
0x16a6   :  { %2034 = vrot.lane.b32.xlu1 %v4158_v20, %s3709_s19 }
0x16aa   :  { %1982 = vrot.lane.b32.xlu1 %v4156_v17, %s3710_s4 }
0x171a   :  { %v1864_v38 = vpop.xlane.xlu1 %1863 }
0x171b   :  { %v1868_v39 = vsub.f32 %v1860_v23, %v1864_v38 }
0x171d   :  { %v1870_v40 = vmul.f32 1.442695, %v1868_v39 }
0x171e   :  { %v1887_v34 = vpop.permute.xlu1 %1886 }
0x171f   :  { %3634 = vpow2.f32 %v1870_v40  ;;  %v1892_v37 = vsel %vm346_vm4, %v1887_v34, 0 }
0x1720   :  { %3388 = vmatpush3.bf16.msra.mxu1 %v1892_v37 }
0x1721   :  { %3399 = vmatprep.subr.bf16.mxu1 %v3702_v1 }
0x1722   :  { %v1867_v42 = vpop.xlane.xlu0 %1866  ;;  %v1985_v56 = vpop.permute.xlu1 %1984 }
0x1723   :  { %v1869_v44 = vsub.f32 %v1861_v35, %v1867_v42  ;;  %v1990_v45 = vsel %vm217_vm3, %v1985_v56, 0 }
0x1725   :  { %v1872_v47 = vmul.f32 1.442695, %v1869_v44 }
0x1726   :  { %v2035_v60 = vpop.permute.xlu1 %2034 }
0x1727   :  { %3636 = vpow2.f32 %v1872_v47  ;;  %v2040_v61 = vsel %vm217_vm3, %v2035_v60, 0 }
0x1729   :  { %v3635_v48 = vpop.eup %3634 }
0x172a   :  { %v1874_v50 = vsel %vm217_vm3, %v3635_v48, 0.0  ;;  %v1983_v32 = vpop.permute.xlu1 %1982 }
0x172b   :  { %1875 = vadd.xlane.f32.xlu0 %v1874_v50 }
0x1731   :  { %v3637_v51 = vpop.eup %3636 }
0x1732   :  { %v1877_v53 = vsel %vm217_vm3, %v3637_v51, 0.0 }
0x1733   :  { %1878 = vadd.xlane.f32.xlu0 %v1877_v53 }
0x1749   :  { %1934 = vrot.lane.b32.xlu0 %v4158_v20, %s3708_s18  ;;  %s4524_s18 = smov 16  }
0x174d   :  { %2032 = vrot.lane.b32.xlu0 %v4158_v20, %s3710_s4 }
0x17b8   :  { %v1876_v54 = vpop.xlane.xlu0 %1875 }
0x17b9   :  { %3638 = vrcp.f32 %v1876_v54 }
0x17c0   :  { %v1879_v57 = vpop.xlane.xlu0 %1878 }
0x17c1   :  { %3640 = vrcp.f32 %v1879_v57 }
0x17c3   :  { %v3639_v55 = vpop.eup %3638 }
0x17c4   :  { %v1881_v11 = vmul.f32 %v3639_v55, %v3635_v48  ;;  %v1935_v58 = vpop.permute.xlu0 %1934 }
0x17c5   :  { %v1940_v59 = vsel %vm346_vm4, %v1935_v58, 0 }
0x17c6   :  { %3394 = vmatpush3.bf16.msra.mxu0 %v1940_v59  ;;  %v1884_v46 = vpack.c.bf16 %v1881_v11, %v1881_v11 }
0x17c7   :  { %3405 = vmatprep.subr.bf16.mxu0 %v3702_v1 }
0x17c8   :  { %3390 = vmatmul.mubr.msk.bf16.vlgmr.msra.gmra.mrb[56].mxu1 %vm217_vm3, %v1884_v46  ;;  %v2033_v62 = vpop.permute.xlu0 %2032 }
0x17c9   :  { %3400 = vmatpush3.bf16.xpose.msra.mxu1 %v1990_v45  ;;  %3401 = vmatprep.mubr.msk.bf16.mxu1 %vm3703_vm1, %v3702_v1 }
0x17ca   :  { %3411 = vmatprep.subr.bf16.mxu1 %v3702_v1 }
0x17cb   :  { %v3641_v27 = vpop.eup %3640 }
0x17cc   :  { %v1883_v49 = vmul.f32 %v3641_v27, %v3637_v51 }
0x17ce   :  { %v1885_v31 = vpack.c.bf16 %v1883_v49, %v1883_v49 }
0x17d0   :  { %3396 = vmatmul.mubr.msk.bf16.vlgmr.msra.gmra.mrb[56].mxu0 %vm217_vm3, %v1885_v31  ;;  %3402 = vmatmul.mubr.msk.bf16.vlgmr.msra.gmra.mrb[60].mxu1 %vm217_vm3, %v1983_v32 }
0x17d1   :  { %3406 = vmatpush3.bf16.xpose.msra.mxu0 %v2040_v61  ;;  %3407 = vmatprep.mubr.msk.bf16.mxu0 %vm3703_vm1, %v3702_v1 }
0x17d2   :  { %3417 = vmatprep.subr.bf16.mxu0 %v3702_v1  ;;  %3413 = vmatprep.mubr.msk.bf16.mxu1 %vm3703_vm1, %v3702_v1 }
0x17d8   :  { %3408 = vmatmul.mubr.msk.bf16.vlgmr.msra.gmra.mrb[60].mxu0 %vm217_vm3, %v2033_v62 }
0x17d9   :  { %3419 = vmatprep.mubr.msk.bf16.mxu0 %vm3703_vm1, %v3702_v1 }
0x189b   :  { %v4266_v63 = vpop.f32.mrb[56].mxu1 }
0x189c   :  { %v3391_v0 = vpop.f32.mrb[57].mxu1 }
0x189d   :  { %v1931_v2 = vpop.f32.mrb[58].mxu1 }
0x189e   :  { %v3392_v3 = vpop.f32.mrb[59].mxu1 }
0x18a3   :  { %v4268_v4 = vpop.f32.mrb[56].mxu0  ;;  %v2026_v5 = vpop.f32.mrb[60].mxu1 }
0x18a4   :  { %v3532_v6 = vpack.i.bf16 %v4268_v4, %v4266_v63  ;;  %v2082_v7 = vmul.f32 0.35355338, %v2026_v5  ;;  %v3397_v9 = vpop.f32.mrb[57].mxu0  ;;  %v3403_v10 = vpop.f32.mrb[61].mxu1 }
0x18a5   :  { %v1979_v13 = vpop.f32.mrb[58].mxu0  ;;  %v2029_v14 = vpop.f32.mrb[62].mxu1 }
0x18a6   :  { %v3398_v15 = vpop.f32.mrb[59].mxu0  ;;  %v3404_v16 = vpop.f32.mrb[63].mxu1  ;;  %v2084_v18 = vadd.f32 %v4179_v33, %v2082_v7 }
0x18a8   :  { %v2086_v19 = vsel %vm217_vm3, %v2084_v18, -inf }
0x18a9   :  { %2087 = vmax.xlane.f32.xlu1 %v2086_v19 }
0x18ab   :  { %v2076_v21 = vpop.f32.mrb[60].mxu0 }
0x18ac   :  { %v2083_v22 = vmul.f32 0.35355338, %v2076_v21  ;;  %v3409_v23 = vpop.f32.mrb[61].mxu0 }
0x18ad   :  { %v2079_v24 = vpop.f32.mrb[62].mxu0 }
0x18ae   :  { %v3410_v25 = vpop.f32.mrb[63].mxu0  ;;  %v2085_v26 = vadd.f32 %v4186_v41, %v2083_v22 }
0x18b0   :  { %v2089_v28 = vsel %vm217_vm3, %v2085_v26, -inf }
0x18b1   :  { %2090 = vmax.xlane.f32.xlu0 %v2089_v28 }
0x18ba   :  { %2110 = vrot.lane.b32.xlu1 %v4156_v17, %s3711_s1 }
0x18be   :  { %2208 = vrot.lane.b32.xlu1 %v4156_v17, %s4520_s27 }
0x18c2   :  { %2258 = vrot.lane.b32.xlu1 %v4158_v20, %s4520_s27 }
0x18c6   :  { %2206 = vrot.lane.b32.xlu1 %v4156_v17, %s4521_s0 }
0x1936   :  { %v2088_v29 = vpop.xlane.xlu1 %2087 }
0x1937   :  { %v2092_v30 = vsub.f32 %v2084_v18, %v2088_v29 }
0x1939   :  { %v2094_v35 = vmul.f32 1.442695, %v2092_v30 }
0x193a   :  { %v2111_v36 = vpop.permute.xlu1 %2110 }
0x193b   :  { %3642 = vpow2.f32 %v2094_v35  ;;  %v2116_v38 = vsel %vm346_vm4, %v2111_v36, 0 }
0x193c   :  { %3412 = vmatpush3.bf16.msra.mxu1 %v2116_v38 }
0x193d   :  { %3423 = vmatprep.subr.bf16.mxu1 %v3702_v1 }
0x193e   :  { %v2091_v39 = vpop.xlane.xlu0 %2090  ;;  %v2209_v53 = vpop.permute.xlu1 %2208 }
0x193f   :  { %v2093_v40 = vsub.f32 %v2085_v26, %v2091_v39  ;;  %v2214_v11 = vsel %vm217_vm3, %v2209_v53, 0  ;;  %v3565_v53 = vld [vmem:[%s4494_s7 + $0x18] sm:$0xff]  }
0x1941   :  { %v2096_v34 = vmul.f32 1.442695, %v2093_v40 }
0x1942   :  { %v2259_v58 = vpop.permute.xlu1 %2258 }
0x1943   :  { %3644 = vpow2.f32 %v2096_v34  ;;  %v2264_v27 = vsel %vm217_vm3, %v2259_v58, 0 }
0x1945   :  { %v3643_v37 = vpop.eup %3642 }
0x1946   :  { %v2098_v42 = vsel %vm217_vm3, %v3643_v37, 0.0  ;;  %v2207_v60 = vpop.permute.xlu1 %2206 }
0x1947   :  { %2099 = vadd.xlane.f32.xlu0 %v2098_v42 }
0x194d   :  { %v3645_v44 = vpop.eup %3644 }
0x194e   :  { %v2101_v47 = vsel %vm217_vm3, %v3645_v44, 0.0 }
0x194f   :  { %2102 = vadd.xlane.f32.xlu0 %v2101_v47 }
0x1965   :  { %2158 = vrot.lane.b32.xlu0 %v4158_v20, %s3711_s1  ;;  %s3678_s1 = scalar_lea.hbm %s4503_s16, 16 }
0x1966   :  { %p3679_p0 = scmp.ne.s32.totalorder %s4503_s16, %s3678_s1  ;;  %p3682_p1 = scmp.lt.u32.totalorder %s3678_s1, %s4503_s16 }
0x1968   :  { %p3684_p2 = pnand %p3682_p1, %p3679_p0 }
0x1969   :  { %2256 = vrot.lane.b32.xlu0 %v4158_v20, %s4521_s0 }
0x19d4   :  { %v2100_v48 = vpop.xlane.xlu0 %2099 }
0x19d5   :  { %3646 = vrcp.f32 %v2100_v48 }
0x19dc   :  { %v2103_v50 = vpop.xlane.xlu0 %2102 }
0x19dd   :  { %3648 = vrcp.f32 %v2103_v50 }
0x19df   :  { %v3647_v51 = vpop.eup %3646 }
0x19e0   :  { %v2105_v54 = vmul.f32 %v3647_v51, %v3643_v37  ;;  %v2159_v57 = vpop.permute.xlu0 %2158  ;;  %v3564_v51 = vld [vmem:[%s4494_s7 + $0x10] sm:$0xff]  }
0x19e1   :  { %v2164_v55 = vsel %vm346_vm4, %v2159_v57, 0 }
0x19e2   :  { %3418 = vmatpush3.bf16.msra.mxu0 %v2164_v55  ;;  %v2108_v56 = vpack.c.bf16 %v2105_v54, %v2105_v54 }
0x19e3   :  { %3429 = vmatprep.subr.bf16.mxu0 %v3702_v1 }
0x19e4   :  { %3414 = vmatmul.mubr.msk.bf16.vlgmr.msra.gmra.mrb[64].mxu1 %vm217_vm3, %v2108_v56  ;;  %v2257_v49 = vpop.permute.xlu0 %2256 }
0x19e5   :  { %3424 = vmatpush3.bf16.xpose.msra.mxu1 %v2214_v11  ;;  %3425 = vmatprep.mubr.msk.bf16.mxu1 %vm3703_vm1, %v3702_v1 }
0x19e6   :  { %3435 = vmatprep.subr.bf16.mxu1 %v3702_v1 }
0x19e7   :  { %v3649_v59 = vpop.eup %3648 }
0x19e8   :  { %v2107_v46 = vmul.f32 %v3649_v59, %v3645_v44 }
0x19ea   :  { %v2109_v45 = vpack.c.bf16 %v2107_v46, %v2107_v46 }
0x19ec   :  { %3420 = vmatmul.mubr.msk.bf16.vlgmr.msra.gmra.mrb[64].mxu0 %vm217_vm3, %v2109_v45  ;;  %3426 = vmatmul.mubr.msk.bf16.vlgmr.msra.gmra.mrb[68].mxu1 %vm217_vm3, %v2207_v60 }
0x19ed   :  { %3430 = vmatpush3.bf16.xpose.msra.mxu0 %v2264_v27  ;;  %3431 = vmatprep.mubr.msk.bf16.mxu0 %vm3703_vm1, %v3702_v1 }
0x19ee   :  { %3441 = vmatprep.subr.bf16.mxu0 %v3702_v1  ;;  %3437 = vmatprep.mubr.msk.bf16.mxu1 %vm3703_vm1, %v3702_v1 }
0x19f4   :  { %3432 = vmatmul.mubr.msk.bf16.vlgmr.msra.gmra.mrb[68].mxu0 %vm217_vm3, %v2257_v49 }
0x19f5   :  { %3443 = vmatprep.mubr.msk.bf16.mxu0 %vm3703_vm1, %v3702_v1 }
0x1ab7   :  { %v2152_v31 = vpop.f32.mrb[64].mxu1 }
0x1ab8   :  { %v3415_v32 = vpop.f32.mrb[65].mxu1 }
0x1ab9   :  { %v2155_v61 = vpop.f32.mrb[66].mxu1 }
0x1aba   :  { %v3416_v62 = vpop.f32.mrb[67].mxu1 }
0x1abf   :  { %v2200_v0 = vpop.f32.mrb[64].mxu0  ;;  %v2250_v2 = vpop.f32.mrb[68].mxu1 }
0x1ac0   :  { %v3537_v3 = vpack.i.bf16 %v2200_v0, %v2152_v31  ;;  %v2306_v5 = vmul.f32 0.35355338, %v2250_v2  ;;  %v3421_v7 = vpop.f32.mrb[65].mxu0  ;;  %v3427_v9 = vpop.f32.mrb[69].mxu1 }
0x1ac1   :  { %v2203_v10 = vpop.f32.mrb[66].mxu0  ;;  %v2253_v13 = vpop.f32.mrb[70].mxu1 }
0x1ac2   :  { %v3422_v14 = vpop.f32.mrb[67].mxu0  ;;  %v3428_v15 = vpop.f32.mrb[71].mxu1  ;;  %v2308_v16 = vadd.f32 %v4179_v33, %v2306_v5 }
0x1ac4   :  { %v2310_v18 = vsel %vm217_vm3, %v2308_v16, -inf }
0x1ac5   :  { %2311 = vmax.xlane.f32.xlu1 %v2310_v18 }
0x1ac7   :  { %v2300_v19 = vpop.f32.mrb[68].mxu0 }
0x1ac8   :  { %v2307_v21 = vmul.f32 0.35355338, %v2300_v19  ;;  %v3433_v22 = vpop.f32.mrb[69].mxu0 }
0x1ac9   :  { %v2303_v23 = vpop.f32.mrb[70].mxu0 }
0x1aca   :  { %v3434_v24 = vpop.f32.mrb[71].mxu0  ;;  %v2309_v25 = vadd.f32 %v4186_v41, %v2307_v21 }
0x1acc   :  { %v2313_v26 = vsel %vm217_vm3, %v2309_v25, -inf }
0x1acd   :  { %2314 = vmax.xlane.f32.xlu0 %v2313_v26 }
0x1ad6   :  { %2334 = vrot.lane.b32.xlu1 %v4156_v17, %s4522_s3 }
0x1ada   :  { %3533 = vrot.lane.b32.xlu1 %v3532_v6, %s4523_s30 }
0x1ade   :  { %3538 = vrot.lane.b32.xlu1 %v3537_v3, %s4524_s18 }
0x1b52   :  { %v2312_v33 = vpop.xlane.xlu1 %2311 }
0x1b53   :  { %v2316_v28 = vsub.f32 %v2308_v16, %v2312_v33 }
0x1b55   :  { %v2318_v29 = vmul.f32 1.442695, %v2316_v28 }
0x1b56   :  { %v2335_v30 = vpop.permute.xlu1 %2334 }
0x1b57   :  { %3650 = vpow2.f32 %v2318_v29  ;;  %v2340_v41 = vsel %vm346_vm4, %v2335_v30, 0 }
0x1b58   :  { %3436 = vmatpush3.bf16.msra.mxu1 %v2340_v41 }
0x1b59   :  { %3447 = vmatprep.subr.bf16.mxu1 %v3702_v1 }
0x1b5a   :  { %v2315_v35 = vpop.xlane.xlu0 %2314  ;;  %v3534_v60 = vpop.permute.xlu1 %3533 }
0x1b5b   :  { %v2317_v36 = vsub.f32 %v2309_v25, %v2315_v35  ;;  %v3536_v49 = vunpack.i.h.bf16 %v3534_v60  ;;  %v3535_v31 = vunpack.i.l.bf16 %v3534_v60 }
0x1b5d   :  { %v2320_v17 = vmul.f32 1.442695, %v2317_v36  ;;  %v2455_v0 = vsel %vm217_vm3, %v4226_v12, %v3536_v49  ;;  %v2454_v2 = vsel %vm217_vm3, %v4224_v43, %v3535_v31  ;;  %v3047_v43 = vld [vmem:[%s4495_s8 + $0x1] ss:$0 sm:$0xff] }
0x1b5e   :  { %v3539_v27 = vpop.permute.xlu1 %3538 }
0x1b5f   :  { %3652 = vpow2.f32 %v2320_v17  ;;  %v3541_v32 = vunpack.i.h.bf16 %v3539_v27  ;;  %v3540_v61 = vunpack.i.l.bf16 %v3539_v27  ;;  %v3566_v17 = vld [vmem:[%s4496_s9 + $0x10] sm:$0xff]  }
0x1b61   :  { %v3651_v38 = vpop.eup %3650  ;;  %v2457_v7 = vsel %vm69_vm0, %v2455_v0, %v3541_v32  ;;  %v2456_v9 = vsel %vm69_vm0, %v2454_v2, %v3540_v61 }
0x1b62   :  { %v2322_v63 = vsel %vm217_vm3, %v3651_v38, 0.0 }
0x1b63   :  { %2323 = vadd.xlane.f32.xlu0 %v2322_v63 }
0x1b69   :  { %v3653_v4 = vpop.eup %3652 }
0x1b6a   :  { %v2325_v6 = vsel %vm217_vm3, %v3653_v4, 0.0 }
0x1b6b   :  { %2326 = vadd.xlane.f32.xlu0 %v2325_v6 }
0x1b81   :  { %2382 = vrot.lane.b32.xlu0 %v4158_v20, %s4522_s3 }
0x1bf0   :  { %v2324_v39 = vpop.xlane.xlu0 %2323 }
0x1bf1   :  { %3654 = vrcp.f32 %v2324_v39 }
0x1bf8   :  { %v2327_v40 = vpop.xlane.xlu0 %2326 }
0x1bf9   :  { %3656 = vrcp.f32 %v2327_v40 }
0x1bfb   :  { %v3655_v34 = vpop.eup %3654 }
0x1bfc   :  { %v2329_v37 = vmul.f32 %v3655_v34, %v3651_v38  ;;  %v2383_v42 = vpop.permute.xlu0 %2382  ;;  %v3567_v38 = vld [vmem:[%s4496_s9 + $0x18] sm:$0xff]  }
0x1bfd   :  { %v2388_v44 = vsel %vm346_vm4, %v2383_v42, 0 }
0x1bfe   :  { %3442 = vmatpush3.bf16.msra.mxu0 %v2388_v44  ;;  %v2332_v47 = vpack.c.bf16 %v2329_v37, %v2329_v37 }
0x1bff   :  { %3455 = vmatprep.subr.bf16.mxu0 %v3702_v1 }
0x1c00   :  { %3438 = vmatmul.mubr.msk.bf16.vlgmr.msra.gmra.mrb[72].mxu1 %vm217_vm3, %v2332_v47 }
0x1c01   :  { %3451 = vmatprep.mubr.msk.bf16.mxu1 %vm3703_vm1, %v3702_v1  ;;  %3448 = vmatpush3.bf16.msra.mxu1 %v3564_v51  ;;  %v3570_v51 = vld [vmem:[%s4498_s11 + $0x50] sm:$0xff]  }
0x1c02   :  { %3449 = vmatprep.subr.bf16.mxu1 %v3702_v1 }
0x1c03   :  { %v3657_v48 = vpop.eup %3656 }
0x1c04   :  { %v2331_v20 = vmul.f32 %v3657_v48, %v3653_v4 }
0x1c05   :  { %3450 = vmatpush3.bf16.msra.mxu1 %v3565_v53  ;;  %v3571_v53 = vld [vmem:[%s4498_s11 + $0x58] sm:$0xff]  }
0x1c06   :  { %v2333_v50 = vpack.c.bf16 %v2331_v20, %v2331_v20  ;;  %3463 = vmatprep.subr.bf16.mxu1 %v3702_v1  ;;  %v3568_v20 = vld [vmem:[%s4498_s11 + $0x40] sm:$0xff]  }
0x1c08   :  { %3444 = vmatmul.mubr.msk.bf16.vlgmr.msra.gmra.mrb[72].mxu0 %vm217_vm3, %v2333_v50  ;;  %v3569_v50 = vld [vmem:[%s4498_s11 + $0x48] sm:$0xff]  }
0x1c09   :  { %3459 = vmatprep.mubr.msk.bf16.mxu0 %vm3703_vm1, %v3702_v1  ;;  %3456 = vmatpush3.bf16.msra.mxu0 %v3566_v17 }
0x1c0a   :  { %3457 = vmatprep.subr.bf16.mxu0 %v3702_v1 }
0x1c0d   :  { %3458 = vmatpush3.bf16.msra.mxu0 %v3567_v38 }
0x1c0e   :  { %3483 = vmatprep.subr.bf16.mxu0 %v3702_v1 }
0x1cd3   :  { %v2376_v54 = vpop.f32.mrb[72].mxu1 }
0x1cd4   :  { %v3439_v57 = vpop.f32.mrb[73].mxu1 }
0x1cd5   :  { %v2379_v55 = vpop.f32.mrb[74].mxu1  ;;  %v3573_v57 = vld [vmem:[%s4498_s11 + $0x68] sm:$0xff]  }
0x1cd6   :  { %v3440_v56 = vpop.f32.mrb[75].mxu1  ;;  %v3574_v55 = vld [vmem:[%s4498_s11 + $0x70] sm:$0xff]  }
0x1cd7   :  { %v3575_v56 = vld [vmem:[%s4498_s11 + $0x78] sm:$0xff]  }
0x1cdb   :  { %v2424_v11 = vpop.f32.mrb[72].mxu0 }
0x1cdc   :  { %v3542_v58 = vpack.i.bf16 %v2424_v11, %v2376_v54  ;;  %v3445_v59 = vpop.f32.mrb[73].mxu0  ;;  %v3572_v54 = vld [vmem:[%s4498_s11 + $0x60] sm:$0xff]  }
0x1cdd   :  { %v2427_v46 = vpop.f32.mrb[74].mxu0  ;;  %v3056_v11 = vld [vmem:[%s4497_s10 + $0x1] ss:$0 sm:$0xff] }
0x1cde   :  { %3543 = vrot.lane.b32.xlu1 %v3542_v58, %s4525_s22  ;;  %v3446_v45 = vpop.f32.mrb[75].mxu0 }
0x1d50   :  { %v3544_v62 = vpop.permute.xlu1 %3543 }
0x1d51   :  { %v3546_v3 = vunpack.i.h.bf16 %v3544_v62  ;;  %v3545_v5 = vunpack.i.l.bf16 %v3544_v62 }
0x1d53   :  { %v2459_v10 = vsel %vm1138_vm5, %v2457_v7, %v3546_v3  ;;  %v2458_v13 = vsel %vm1138_vm5, %v2456_v9, %v3545_v5 }
0x1d54   :  { %v2460_v14 = vpack.c.bf16 %v2459_v10, %v2458_v13 }
0x1d56   :  { %3452 = vmatmul.mubr.msk.bf16.vlgmr.msra.gmra.mrb[76].mxu1 %vm116_vm2, %v2460_v14 }
0x1d57   :  { %3479 = vmatprep.mubr.msk.bf16.mxu1 %vm3703_vm1, %v3702_v1  ;;  %3464 = vmatpush3.bf16.msra.mxu1 %v3568_v20 }
0x1d58   :  { %3465 = vmatprep.subr.bf16.mxu1 %v3702_v1 }
0x1d5b   :  { %3466 = vmatpush3.bf16.msra.mxu1 %v3569_v50 }
0x1d5c   :  { %3467 = vmatprep.subr.bf16.mxu1 %v3702_v1 }
0x1d5f   :  { %3468 = vmatpush3.bf16.msra.mxu1 %v3570_v51 }
0x1d60   :  { %3469 = vmatprep.subr.bf16.mxu1 %v3702_v1 }
0x1d63   :  { %3470 = vmatpush3.bf16.msra.mxu1 %v3571_v53 }
0x1d64   :  { %3471 = vmatprep.subr.bf16.mxu1 %v3702_v1 }
0x1d67   :  { %3472 = vmatpush3.bf16.msra.mxu1 %v3572_v54 }
0x1d68   :  { %3473 = vmatprep.subr.bf16.mxu1 %v3702_v1 }
0x1d6b   :  { %3474 = vmatpush3.bf16.msra.mxu1 %v3573_v57 }
0x1d6c   :  { %3475 = vmatprep.subr.bf16.mxu1 %v3702_v1 }
0x1d6f   :  { %3476 = vmatpush3.bf16.msra.mxu1 %v3574_v55 }
0x1d70   :  { %3477 = vmatprep.subr.bf16.mxu1 %v3702_v1 }
0x1d73   :  { %3478 = vmatpush3.bf16.msra.mxu1 %v3575_v56 }
0x1e29   :  { %v2523_v12 = vpop.f32.mrb[76].mxu1 }
0x1e2a   :  { %v2524_v15 = vadd.f32 %v3047_v43, %v2523_v12  ;;  %v3453_v16 = vpop.f32.mrb[77].mxu1 }
0x1e2b   :  { %v2526_v18 = vpop.f32.mrb[78].mxu1 }
0x1e2c   :  { %v4359_v19 = vadd.f32 %v2524_v15, %v4129_v52  ;;  %v2527_v21 = vadd.f32 %v3047_v43, %v2526_v18  ;;  %v3454_v22 = vpop.f32.mrb[79].mxu1 }
0x1e2e   :  { %v4362_v23 = vadd.f32 %v2527_v21, %v4132_v8  ;;  %v2532_v24 = vsel %vm116_vm2, %v4359_v19, 0.0  ;;  %v3077_v21 = vld [vmem:[%s4499_s12 + $0x1] ss:$0 sm:$0xff] }
0x1e2f   :  { %2533 = vadd.xlane.f32.xlu0 %v2532_v24 }
0x1e30   :  { %v2535_v25 = vsel %vm116_vm2, %v4362_v23, 0.0 }
0x1e31   :  { %2536 = vadd.xlane.f32.xlu1 %v2535_v25 }
0x1ebc   :  { %v2534_v26 = vpop.xlane.xlu0 %2533 }
0x1ebd   :  { %v2538_v33 = vmul.f32 0.03125, %v2534_v26 }
0x1ebe   :  { %v2537_v28 = vpop.xlane.xlu1 %2536 }
0x1ebf   :  { %v2540_v29 = vsub.f32 %v4359_v19, %v2538_v33  ;;  %v2539_v52 = vmul.f32 0.03125, %v2537_v28 }
0x1ec1   :  { %v2541_v30 = vsub.f32 %v4362_v23, %v2539_v52  ;;  %v2542_v41 = vmul.f32 %v2540_v29, %v2540_v29 }
0x1ec3   :  { %v2544_v8 = vsel %vm116_vm2, %v2542_v41, 0.0  ;;  %v2543_v35 = vmul.f32 %v2541_v30, %v2541_v30 }
0x1ec4   :  { %2545 = vadd.xlane.f32.xlu0 %v2544_v8 }
0x1ec5   :  { %v2547_v36 = vsel %vm116_vm2, %v2543_v35, 0.0 }
0x1ec8   :  { %2548 = vadd.xlane.f32.xlu0 %v2547_v36 }
0x1f51   :  { %v2546_v63 = vpop.xlane.xlu0 %2545 }
0x1f52   :  { %v2550_v4 = vmul.f32 0.03125, %v2546_v63 }
0x1f54   :  { %v2552_v6 = vadd.f32 1e-05, %v2550_v4 }
0x1f55   :  { %v2549_v39 = vpop.xlane.xlu0 %2548 }
0x1f56   :  { %v2551_v40 = vmul.f32 0.03125, %v2549_v39  ;;  %3658 = vrsqrt.f32 %v2552_v6 }
0x1f58   :  { %v2553_v34 = vadd.f32 1e-05, %v2551_v40  ;;  %v3577_v40 = vld [vmem:[%s4500_s13 + $0x8] sm:$0xff]  }
0x1f5a   :  { %3660 = vrsqrt.f32 %v2553_v34 }
0x1f60   :  { %v3659_v37 = vpop.eup %3658 }
0x1f61   :  { %v2556_v44 = vmul.f32 %v3659_v37, %v2540_v29 }
0x1f64   :  { %v3661_v42 = vpop.eup %3660 }
0x1f65   :  { %v2557_v47 = vmul.f32 %v3661_v42, %v2541_v30 }
0x1f67   :  { %v2558_v48 = vpack.c.bf16 %v2557_v47, %v2556_v44 }
0x1f69   :  { %3460 = vmatmul.mubr.msk.bf16.vlgmr.msra.gmra.mrb[76].mxu0 %vm116_vm2, %v2558_v48 }
0x1f6a   :  { %3487 = vmatprep.mubr.msk.bf16.mxu0 %vm3703_vm1, %v3702_v1 }
0x203c   :  { %v2621_v58 = vpop.f32.mrb[76].mxu0 }
0x203d   :  { %v2622_v59 = vadd.f32 %v3056_v11, %v2621_v58  ;;  %v3461_v46 = vpop.f32.mrb[77].mxu0 }
0x203e   :  { %v2624_v45 = vpop.f32.mrb[78].mxu0 }
0x203f   :  { %v2630_v60 = vmul.f32 0.044715, %v2622_v59  ;;  %v2625_v27 = vadd.f32 %v3056_v11, %v2624_v45  ;;  %v3462_v49 = vpop.f32.mrb[79].mxu0  ;;  %v2628_v14 = vmul.f32 0.5, %v2622_v59 }
0x2040   :  { %v2857_v49 = vlaneseq }
0x2041   :  { %v2632_v31 = vmul.f32 %v2630_v60, %v2622_v59  ;;  %v2631_v32 = vmul.f32 0.044715, %v2625_v27  ;;  %v2629_v43 = vmul.f32 0.5, %v2625_v27 }
0x2043   :  { %v2634_v61 = vmul.f32 %v2632_v31, %v2622_v59  ;;  %v2633_v62 = vmul.f32 %v2631_v32, %v2625_v27  ;;  %v2858_v31 = vand.u32 127, %v2857_v49 }
0x2045   :  { %v2636_v0 = vadd.f32 %v2634_v61, %v2622_v59  ;;  %v2635_v2 = vmul.f32 %v2633_v62, %v2625_v27  ;;  %vm2859_vm6 = vcmp.ge.s32.totalorder %v2858_v31, 16 }
0x2047   :  { %v2638_v3 = vmul.f32 0.7978846, %v2636_v0  ;;  %v2637_v5 = vadd.f32 %v2635_v2, %v2625_v27 }
0x2049   :  { %3662 = vtanh.f32 %v2638_v3  ;;  %v2639_v7 = vmul.f32 0.7978846, %v2637_v5 }
0x204b   :  { %3664 = vtanh.f32 %v2639_v7  ;;  %v2890_v7 = vld [vmem:[%s4489_s2] sm:$0xff] }
0x204c   :  { %vm2892_vm8 = vcmp.gt.f32.partialorder %v2890_v7, 0.5 }
0x2053   :  { %v3663_v9 = vpop.eup %3662 }
0x2054   :  { %v2642_v10 = vadd.f32 1.0, %v3663_v9  ;;  %v2891_v9 = vld [vmem:[%s4489_s2 + $0x8] sm:$0xff] }
0x2055   :  { %v3665_v13 = vpop.eup %3664  ;;  %vm2893_vm9 = vcmp.gt.f32.partialorder %v2891_v9, 0.5 }
0x2056   :  { %v2643_v12 = vadd.f32 1.0, %v3665_v13  ;;  %v2644_v15 = vmul.f32 %v2642_v10, %v2628_v14 }
0x2058   :  { %v2645_v16 = vmul.f32 %v2643_v12, %v2629_v43  ;;  %v2897_v43 = vsel %vm2896_vm7, %v2890_v7, 0.0  ;;  %v2898_v12 = vsel %vm2896_vm7, %v2891_v9, 0.0 }
0x205a   :  { %v2646_v18 = vpack.c.bf16 %v2645_v16, %v2644_v15 }
0x205c   :  { %3480 = vmatmul.mubr.bf16.vlgmr.msra.gmra.mrb[80].mxu1 %v2646_v18 }
0x212f   :  { %v2754_v22 = vpop.f32.mrb[80].mxu1 }
0x2130   :  { %v2755_v24 = vadd.f32 %v3077_v21, %v2754_v22  ;;  %v3481_v25 = vpop.f32.mrb[81].mxu1 }
0x2131   :  { %v2757_v26 = vpop.f32.mrb[82].mxu1 }
0x2132   :  { %v2761_v33 = vadd.f32 %v2755_v24, %v4359_v19  ;;  %v2758_v28 = vadd.f32 %v3077_v21, %v2757_v26  ;;  %v3482_v29 = vpop.f32.mrb[83].mxu1  ;;  %v2899_v24 = vadd.f32 %v2898_v12, %v2897_v43 }
0x2134   :  { %v2762_v52 = vadd.f32 %v2758_v28, %v4362_v23  ;;  %v2763_v30 = vsel %vm116_vm2, %v2761_v33, 0.0  ;;  %v3576_v23 = vld [vmem:[%s4500_s13] sm:$0xff]  }
0x2135   :  { %2764 = vadd.xlane.f32.xlu0 %v2763_v30  ;;  %3484 = vmatpush3.bf16.msra.mxu0 %v3576_v23 }
0x2136   :  { %v2766_v41 = vsel %vm116_vm2, %v2762_v52, 0.0  ;;  %3485 = vmatprep.subr.bf16.mxu0 %v3702_v1  ;;  %v3086_v1 = vld [vmem:[%s4501_s14] ss:$0 sm:$0xff] }
0x2137   :  { %2767 = vadd.xlane.f32.xlu1 %v2766_v41 }
0x2139   :  { %3486 = vmatpush3.bf16.msra.mxu0 %v3577_v40 }
0x21c2   :  { %v2765_v8 = vpop.xlane.xlu0 %2764 }
0x21c3   :  { %v2769_v35 = vmul.f32 0.03125, %v2765_v8 }
0x21c4   :  { %v2768_v36 = vpop.xlane.xlu1 %2767 }
0x21c5   :  { %v2771_v17 = vsub.f32 %v2761_v33, %v2769_v35  ;;  %v2770_v38 = vmul.f32 0.03125, %v2768_v36 }
0x21c7   :  { %v2772_v63 = vsub.f32 %v2762_v52, %v2770_v38  ;;  %v2773_v4 = vmul.f32 %v2771_v17, %v2771_v17 }
0x21c9   :  { %v2775_v6 = vsel %vm116_vm2, %v2773_v4, 0.0  ;;  %v2774_v19 = vmul.f32 %v2772_v63, %v2772_v63 }
0x21ca   :  { %2776 = vadd.xlane.f32.xlu0 %v2775_v6 }
0x21cb   :  { %v2778_v39 = vsel %vm116_vm2, %v2774_v19, 0.0 }
0x21cc   :  { %2779 = vadd.xlane.f32.xlu1 %v2778_v39 }
0x2257   :  { %v2777_v34 = vpop.xlane.xlu0 %2776 }
0x2258   :  { %v2781_v37 = vmul.f32 0.03125, %v2777_v34 }
0x2259   :  { %v2780_v42 = vpop.xlane.xlu1 %2779 }
0x225a   :  { %v2783_v44 = vadd.f32 1e-05, %v2781_v37  ;;  %v2782_v47 = vmul.f32 0.03125, %v2780_v42 }
0x225c   :  { %3666 = vrsqrt.f32 %v2783_v44  ;;  %v2784_v48 = vadd.f32 1e-05, %v2782_v47 }
0x225e   :  { %3668 = vrsqrt.f32 %v2784_v48 }
0x2266   :  { %v3667_v20 = vpop.eup %3666 }
0x2267   :  { %v2787_v51 = vmul.f32 %v3667_v20, %v2771_v17 }
0x2268   :  { %v3669_v50 = vpop.eup %3668 }
0x2269   :  { %v2788_v53 = vmul.f32 %v3669_v50, %v2772_v63 }
0x226b   :  { %v2789_v54 = vpack.c.bf16 %v2788_v53, %v2787_v51 }
0x226d   :  { %3488 = vmatmul.mubr.msk.bf16.vlgmr.msra.gmra.mrb[80].mxu0 %vm116_vm2, %v2789_v54 }
0x2340   :  { %v2850_v57 = vpop.f32.mrb[80].mxu0 }
0x2341   :  { %v2851_v55 = vadd.f32 %v3086_v1, %v2850_v57  ;;  %v3489_v56 = vpop.f32.mrb[81].mxu0 }
0x2342   :  { %v2853_v11 = vpop.f32.mrb[82].mxu0 }
0x2343   :  { %v2860_v58 = vmul.f32 0.5, %v2851_v55  ;;  %v2854_v59 = vadd.f32 %v3086_v1, %v2853_v11  ;;  %v3490_v46 = vpop.f32.mrb[83].mxu0  ;;  %v2876_v13 = vmul.f32 %v2851_v55, %v2851_v55 }
0x2345   :  { %v2862_v45 = vmul.f32 1.442695, %v2860_v58  ;;  %v2861_v60 = vmul.f32 0.5, %v2854_v59  ;;  %v2877_v18 = vmul.f32 %v2854_v59, %v2854_v59 }
0x2347   :  { %3670 = vpow2.f32 %v2862_v45  ;;  %v2864_v27 = vmul.f32 1.442695, %v2861_v60 }
0x2349   :  { %3672 = vpow2.f32 %v2864_v27 }
0x2351   :  { %v3671_v32 = vpop.eup %3670 }
0x2352   :  { %v2870_v61 = vmul.f32 %v3671_v32, %v3671_v32  ;;  %v2866_v62 = vsel %vm2859_vm6, %v3671_v32, %v2851_v55 }
0x2353   :  { %v3673_v0 = vpop.eup %3672  ;;  %2868 = vst.msk [vmem:[%s4502_s15] sm:$0xff] %vm116_vm2, %v2866_v62 }
0x2354   :  { %v2872_v2 = vsub.f32 %v2870_v61, %v2851_v55  ;;  %v2867_v3 = vsel %vm2859_vm6, %v3673_v0, %v2854_v59  ;;  %v2871_v5 = vmul.f32 %v3673_v0, %v3673_v0 }
0x2355   :  { %2869 = vst.msk [vmem:[%s4502_s15 + $0x8] sm:$0xff] %vm116_vm2, %v2867_v3 }
0x2356   :  { %v3090_v10 = vadd.f32 -1.0, %v2872_v2  ;;  %v2873_v14 = vsub.f32 %v2871_v5, %v2854_v59 }
0x2358   :  { %v2878_v15 = vsel %vm2859_vm6, %v3090_v10, %v2876_v13  ;;  %v3091_v16 = vadd.f32 -1.0, %v2873_v14 }
0x2359   :  { %v2880_v21 = vsel %vm116_vm2, %v2878_v15, 0.0 }
0x235a   :  { %2881 = vadd.xlane.f32.xlu0 %v2880_v21  ;;  %v2879_v22 = vsel %vm2859_vm6, %v3091_v16, %v2877_v18 }
0x235b   :  { %v2883_v25 = vsel %vm116_vm2, %v2879_v22, 0.0 }
0x235c   :  { %2884 = vadd.xlane.f32.xlu1 %v2883_v25 }
0x235e   :  { %2900 = vadd.xlane.f32.xlu0 %v2899_v24 }
0x23e7   :  { %v2882_v26 = vpop.xlane.xlu0 %2881 }
0x23e8   :  { %v2886_v33 = vmul.f32 0.5, %v2882_v26 }
0x23e9   :  { %v2885_v28 = vpop.xlane.xlu1 %2884 }
0x23ea   :  { %v2888_v29 = vmul.f32 0.0625, %v2886_v33  ;;  %v2887_v52 = vmul.f32 0.5, %v2885_v28 }
0x23eb   :  { %v2901_v30 = vpop.xlane.xlu0 %2900 }
0x23ec   :  { %v2894_v41 = vsel %vm2892_vm8, %v2888_v29, 0.0  ;;  %v2889_v8 = vmul.f32 0.0625, %v2887_v52  ;;  %v2902_v35 = vrot.slane %v2901_v30, 4 }
0x23ed   :  { %vm2909_vm10 = vcmp.gt.f32.partialorder %v2894_v41, 0.5  ;;  %v2931_v63 = vsel %vm2896_vm7, %v2894_v41, 0.0 }
0x23ee   :  { %v2911_v36 = vsel %vm2909_vm10, %v2894_v41, 0.0  ;;  %v2895_v17 = vsel %vm2893_vm9, %v2889_v8, 0.0  ;;  %v2903_v38 = vadd.f32 %v2902_v35, %v2901_v30 }
0x23ef   :  { %vm2910_vm11 = vcmp.gt.f32.partialorder %v2895_v17, 0.5  ;;  %v2932_v4 = vsel %vm2896_vm7, %v2895_v17, 0.0  ;;  %v2913_v23 = vsel %vm2896_vm7, %v2911_v36, 0.0 }
0x23f0   :  { %v2912_v6 = vsel %vm2910_vm11, %v2895_v17, 0.0  ;;  %v2933_v19 = vadd.f32 %v2932_v4, %v2931_v63  ;;  %v2904_v39 = vrot.slane %v2903_v38, 2 }
0x23f1   :  { %v2914_v40 = vsel %vm2896_vm7, %v2912_v6, 0.0 }
0x23f2   :  { %2934 = vadd.xlane.f32.xlu0 %v2933_v19  ;;  %v2915_v34 = vadd.f32 %v2914_v40, %v2913_v23  ;;  %v2905_v37 = vadd.f32 %v2904_v39, %v2903_v38 }
0x23f4   :  { %2916 = vadd.xlane.f32.xlu1 %v2915_v34  ;;  %v2906_v42 = vrot.slane %v2905_v37, 1 }
0x23f6   :  { %v2907_v44 = vadd.f32 %v2906_v42, %v2905_v37 }
0x23f8   :  { %3491 = vpush %v2907_v44 }
0x2429   :  { %s3492_s2 = spop %3491 }
0x242a   :  { %v2925_v20 = vstv %s3492_s2 }
0x242b   :  { %3674 = vrcp.f32 %v2925_v20 }
0x2435   :  { %v3675_v46 = vpop.eup %3674 }
0x247f   :  { %v2935_v47 = vpop.xlane.xlu0 %2934 }
0x2480   :  { %v2936_v48 = vrot.slane %v2935_v47, 4 }
0x2481   :  { %v2917_v50 = vpop.xlane.xlu1 %2916 }
0x2482   :  { %v2937_v51 = vadd.f32 %v2936_v48, %v2935_v47  ;;  %v2918_v53 = vrot.slane %v2917_v50, 4 }
0x2484   :  { %v2938_v54 = vrot.slane %v2937_v51, 2  ;;  %v2919_v1 = vadd.f32 %v2918_v53, %v2917_v50 }
0x2486   :  { %v2939_v57 = vadd.f32 %v2938_v54, %v2937_v51  ;;  %v2920_v55 = vrot.slane %v2919_v1, 2 }
0x2488   :  { %v2921_v56 = vadd.f32 %v2920_v55, %v2919_v1  ;;  %v2940_v58 = vrot.slane %v2939_v57, 1 }
0x248a   :  { %v2922_v11 = vrot.slane %v2921_v56, 1  ;;  %v2941_v45 = vadd.f32 %v2940_v58, %v2939_v57 }
0x248c   :  { %v2923_v59 = vadd.f32 %v2922_v11, %v2921_v56 }
0x248e   :  { %3493 = vpush %v2923_v59 }
0x248f   :  { %3495 = vpush %v3675_v46 }
0x2490   :  { %3497 = vpush %v2941_v45 }
0x24bf   :  { %s3494_s15 = spop %3493 }
0x24c0   :  { %s3496_s0 = spop %3495 }
0x24c1   :  { %s3498_s3 = spop %3497  ;;  %s2928_s30 = smul.f32 %s3496_s0, %s3494_s15 }
0x24c2   :  { %s2946_s18 = smul.f32 %s3498_s3, %s3496_s0 }
0x24c3   :  { %2930 = sst [smem:[#allocation2]] %s2928_s30 }
0x24c4   :  { %2948 = sst [smem:[#allocation4]] %s2946_s18 }
0x24c5   :  { %3687 = shalt.err (!%p3684_p2)
}
0x24c6   :  { %s3718_s10 = smov [#allocation2]   ;;  %s3688_s26 = scalar_lea.hbm %s4504_s17, 16 }
0x24c7   :  { %2958 = dma.smem_to_hbm %s3718_s10, 16, %s4503_s16, [#allocation3]  }
0x24c8   :  { %p3689_p3 = scmp.ne.s32.totalorder %s4504_s17, %s3688_s26  ;;  %p3692_p4 = scmp.lt.u32.totalorder %s3688_s26, %s4504_s17 }
0x24ca   :  { %p3694_p5 = pnand %p3692_p4, %p3689_p3 }
0x24cc   :  { %3697 = shalt.err (!%p3694_p5)
}
0x24cd   :  { %s3719_s20 = smov [#allocation4]  }
0x24ce   :  { %2966 = dma.smem_to_hbm %s3719_s20, 16, %s4504_s17, [#allocation5]  }
0x24cf   :  { %3698 = dma.done.wait [#allocation3], 16  }
0x24d0   :  { %3699 = vsyncadd [#allocation3], 4294967280 }
0x24d1   :  { %3700 = dma.done.wait [#allocation5], 16  }
0x24d2   :  { %3701 = vsyncadd [#allocation5], 4294967280 }
0x24d3   :  { %2975 = sfence }
0x24d4   :  { %2976 = vsyncpa [#allocation3], 1 }
0x24d5   :  { %2977 = vsyncpa [#allocation5], 1 }

</bundles_post_ra>
